<compile_context>
chip_gen: v6e
topology: v6e:2x2x1
jax: 0.10.0
libtpu: 0.0.40
codegen_flags: <defaults>
</compile_context>

<pallas_src>
import functools

import numpy as np
import jax
import jax.numpy as jnp
from jax.experimental import pallas as pl
from jax.experimental.pallas import tpu as pltpu

# ---------------- configuration (small demo sizes) ----------------
EMBED_DIMS = 32
NUM_GROUPS = 8
GROUP_DIMS = EMBED_DIMS // NUM_GROUPS
NUM_LEVELS = 2
NUM_CAMS = 1                       # the lidar/BEV deformable path requires num_cams == 1
NUM_FIX_PTS = 7
NUM_LEARNABLE_PTS = 1
NUM_PTS = NUM_FIX_PTS + NUM_LEARNABLE_PTS
BS = 2
NUM_ANCHOR = 16
ANCHOR_TILE = 8                    # anchors per grid step ("parallel" second grid axis)
LEVEL_SHAPES = ((16, 16), (8, 8))  # (H, W) of each BEV feature level
CAV_LIDAR_RANGE = (-140.8, -40.0, -3.0, 140.8, 40.0, 1.0)
FEAT_DTYPE = jnp.bfloat16          # sampling matmul precision (set float32 for exact)

CLP = NUM_CAMS * NUM_LEVELS * NUM_PTS        # softmax axis length of _get_weights (=16)
DW = NUM_GROUPS * CLP                        # weights_fc output features (=128)
LG = NUM_LEVELS * NUM_GROUPS                 # per-query weight columns consumed by DAF
Q_TILE = ANCHOR_TILE * NUM_PTS               # queries per grid step

assert EMBED_DIMS % NUM_GROUPS == 0
assert NUM_ANCHOR % ANCHOR_TILE == 0
assert CLP & (CLP - 1) == 0, "roll-based grouped softmax needs power-of-two cams*levels*pts"
# lane-rotation shifts that all-reduce within each group (columns with equal index % G)
GROUP_SHIFTS = tuple(NUM_GROUPS << k for k in range(CLP.bit_length() - 1))

LEVEL_OFFSETS = []
_off = 0
for (_h, _w) in LEVEL_SHAPES:
    LEVEL_OFFSETS.append(_off)
    _off += _h * _w
LEVEL_OFFSETS = tuple(LEVEL_OFFSETS)
THW = _off


# ---------------- host-side static constants (built once, passed as inputs) ----------------
def _build_grid_xy():
    cols = []
    for (h, w) in LEVEL_SHAPES:
        j = np.arange(h * w)
        cols.append(np.stack([j % w, j // w], axis=0).astype(np.float32))   # rows: x, y
    return np.concatenate(cols, axis=1)                                     # [2, THW]


def _build_static_selectors():
    """Tile-local selection matrices (query order inside a tile is point-major:
    q = p * ANCHOR_TILE + a)."""
    q = np.arange(Q_TILE)
    a = np.arange(ANCHOR_TILE)
    rep = (q[:, None] % ANCHOR_TILE == a[None, :]).astype(np.float32)       # [Q_TILE, A]
    c = np.arange(DW)
    pmask = ((c[None, :] // LG) == (q[:, None] // ANCHOR_TILE)).astype(np.float32)
    m = np.arange(NUM_LEVELS * EMBED_DIMS)
    mexp = ((c[:, None] % LG)
            == (m[None, :] // EMBED_DIMS) * NUM_GROUPS
            + (m[None, :] % EMBED_DIMS) // GROUP_DIMS).astype(np.float32)   # [DW, L*D]
    return rep, pmask, mexp


GRID_XY = _build_grid_xy()
REP_MAT, PMASK_MAT, MEXP_MAT = _build_static_selectors()


# =========================== fused forward kernel ===========================
def _fused_kernel(inst_ref, emb_ref, coords_ref, feat_ref, grid_ref,
                  wfc_w_ref, wfc_b_ref, out_w_ref, out_b_ref,
                  rep_ref, pmask_ref, mexp_ref, out_ref, *,
                  level_shapes, level_offsets, group_shifts, num_pts, feat_dtype):
    f32 = jnp.float32
    inst = inst_ref[0]                       # [tile_n, D]
    emb = emb_ref[0]                         # [tile_n, D]
    coords = coords_ref[0]                   # [q_tile, 2*L]  (x_l, y_l per level, point-major)
    tile_n, d = inst.shape
    q = coords.shape[0]

    # ---- 1. weights_fc + per-group softmax (group of column c is c % G) ----------
    logits = (jnp.dot(inst + emb, wfc_w_ref[...], preferred_element_type=f32)
              + wfc_b_ref[...])                               # [tile_n, DW]
    m = logits
    for sh in group_shifts:                                   # per-group max via XLU rolls
        m = jnp.maximum(m, pltpu.roll(m, sh, axis=1))
    e = jnp.exp(logits - m)                                   # group max -> exp(0)=1, den >= 1
    den = e
    for sh in group_shifts:                                   # per-group sum via XLU rolls
        den = den + pltpu.roll(den, sh, axis=1)
    r = pl.reciprocal(den, approx=True)                       # EUP slot
    r = r * (2.0 - den * r)                                    # one Newton step -> f32 accuracy
    w_soft = e * r                                             # [tile_n, DW]

    # ---- 2. per-query weight expansion (tile-local constant selectors) -----------
    # rep: anchor row replication, pmask: keep only this query's key-point columns,
    # mexp: (level, group) -> (level, channel) broadcast.  All O(tile) sized.
    w_q = jnp.dot(rep_ref[...], w_soft, preferred_element_type=f32)          # [q, DW]
    w_full = jnp.dot(w_q * pmask_ref[...], mexp_ref[...],
                     preferred_element_type=f32)                              # [q, L*D]

    # ---- 3. bilinear sampling per level (triangle weights, bf16 MXU pass) --------
    # TODO(synk): replace with a scalar-prefetch 4-corner DMA gather at production HW sizes.
    acc = jnp.zeros((q, d), f32)
    for lvl, (h, w) in enumerate(level_shapes):
        hw = h * w
        off = level_offsets[lvl]
        x = coords[:, 2 * lvl:2 * lvl + 1]                    # [q, 1] continuous col coord
        y = coords[:, 2 * lvl + 1:2 * lvl + 2]                # [q, 1] continuous row coord
        jx = grid_ref[0:1, off:off + hw]                      # [1, hw] precomputed col index
        jy = grid_ref[1:2, off:off + hw]                      # [1, hw] precomputed row index
        wx = jnp.maximum(1.0 - jnp.abs(jx - x), 0.0)          # triangle == bilinear weight
        wy = jnp.maximum(1.0 - jnp.abs(jy - y), 0.0)          #   with zero padding at borders
        s = (wy * wx).astype(feat_dtype)                      # [q, hw]
        sampled = jnp.dot(s, feat_ref[0, off:off + hw, :],
                          preferred_element_type=f32)         # [q, D]
        acc = acc + sampled * w_full[:, lvl * d:(lvl + 1) * d]

    # ---- 4. sum over key points: queries are point-major, so this is num_pts
    # ----    contiguous sublane slices added on the VPU (no one-hot matmul) --------
    f_sum = acc[0:tile_n, :]
    for p in range(1, num_pts):
        f_sum = f_sum + acc[p * tile_n:(p + 1) * tile_n, :]

    # ---- 5. output projection + residual add -------------------------------------
    # TODO(synk): for D<128, a fully lane-dense output slab (tile_n*D reshaped to 128-lane
    # rows) would avoid masked vst; kept as (tile_n, D) here for lowering robustness.
    out = jnp.dot(f_sum, out_w_ref[...], preferred_element_type=f32) + out_b_ref[...]
    out_ref[0] = out + inst


def fused_forward(instance_feature, anchor_embed, coords, feat_flat, params):
    bs, n, d = instance_feature.shape
    n_tiles = n // ANCHOR_TILE
    thw = feat_flat.shape[1]
    kern = functools.partial(
        _fused_kernel, level_shapes=tuple(LEVEL_SHAPES), level_offsets=LEVEL_OFFSETS,
        group_shifts=GROUP_SHIFTS, num_pts=NUM_PTS, feat_dtype=feat_flat.dtype)
    return pl.pallas_call(
        kern,
        out_shape=jax.ShapeDtypeStruct((bs, n, d), jnp.float32),
        grid=(bs, n_tiles),
        in_specs=[
            pl.BlockSpec((1, ANCHOR_TILE, d), lambda b, t: (b, t, 0)),    # instance_feature
            pl.BlockSpec((1, ANCHOR_TILE, d), lambda b, t: (b, t, 0)),    # anchor_embed
            pl.BlockSpec((1, Q_TILE, 2 * NUM_LEVELS), lambda b, t: (b, t, 0)),  # coords
            # full multi-level map per batch; block index constant in t -> fetched once per b.
            # TODO(synk): at production sizes keep this in HBM (memory_space=pl.ANY) and DMA
            # only gathered corner rows (critical for v7x's 64 MiB VMEM).
            pl.BlockSpec((1, thw, d), lambda b, t: (b, 0, 0)),            # BEV features (bf16)
            pl.BlockSpec((2, thw), lambda b, t: (0, 0)),                  # grid x/y coords
            pl.BlockSpec((d, DW), lambda b, t: (0, 0)),                   # weights_fc (permuted)
            pl.BlockSpec((1, DW), lambda b, t: (0, 0)),
            pl.BlockSpec((d, d), lambda b, t: (0, 0)),                    # output_proj
            pl.BlockSpec((1, d), lambda b, t: (0, 0)),
            pl.BlockSpec((Q_TILE, ANCHOR_TILE), lambda b, t: (0, 0)),     # rep (tile-local)
            pl.BlockSpec((Q_TILE, DW), lambda b, t: (0, 0)),              # point mask
            pl.BlockSpec((DW, NUM_LEVELS * d), lambda b, t: (0, 0)),      # group->channel expand
        ],
        out_specs=pl.BlockSpec((1, ANCHOR_TILE, d), lambda b, t: (b, t, 0)),
        compiler_params=pltpu.CompilerParams(
            dimension_semantics=("parallel", "parallel"),
            vmem_limit_bytes=64 * 1024 * 1024),
    )(instance_feature, anchor_embed, coords, feat_flat, GRID_XY,
      params['wfc_w_perm'], params['wfc_b_perm'], params['out_w'],
      params['out_b'].reshape(1, d), REP_MAT, PMASK_MAT, MEXP_MAT)


# ============================ glue: key point generator ============================
FIX_SCALE = jnp.array(
    [[0.0, 0.0, 0.0], [0.45, 0.0, 0.0], [-0.45, 0.0, 0.0], [0.0, 0.45, 0.0],
     [0.0, -0.45, 0.0], [0.0, 0.0, 0.45], [0.0, 0.0, -0.45]], jnp.float32)


def key_points_generator(anchor, instance_feature, w_kps, b_kps):
    # TODO(synk): SparseBox3DKeyPointsGenerator is not included in the reference file;
    # implemented the standard Sparse4D fixed+learnable keypoint generation in plain JAX.
    bs, n, _ = anchor.shape
    fix = jnp.broadcast_to(FIX_SCALE, (bs, n, NUM_FIX_PTS, 3))
    learn = jax.nn.sigmoid(instance_feature @ w_kps + b_kps)
    learn = learn.reshape(bs, n, NUM_LEARNABLE_PTS, 3) - 0.5
    scale = jnp.concatenate([fix, learn], axis=2)                # [bs, n, P, 3]
    size = jnp.exp(anchor[..., 3:6])[:, :, None, :]
    kp = scale * size
    sin_y = anchor[..., 6][:, :, None]
    cos_y = anchor[..., 7][:, :, None]
    kx = cos_y * kp[..., 0] - sin_y * kp[..., 1]
    ky = sin_y * kp[..., 0] + cos_y * kp[..., 1]
    kp = jnp.stack([kx, ky, kp[..., 2]], axis=-1)
    return kp + anchor[..., None, :3]


# ================================ full forward ================================
def prepare_feature_maps(feature_maps):
    """NCHW multi-level maps -> [bs, sum(H*W), D] bf16.  Done once, outside the per-call
    hot path (in a real pipeline the producer would emit / cache this layout)."""
    bs = feature_maps[0].shape[0]
    d = EMBED_DIMS
    cols = []
    for fm in feature_maps:
        h, w = fm.shape[-2:]
        cols.append(jnp.transpose(fm[:, 0].reshape(bs, d, h * w), (0, 2, 1)))
    return jnp.concatenate(cols, axis=1).astype(FEAT_DTYPE)


def lidar_deformable_feature_aggregation(instance_feature, anchor, anchor_embed,
                                         feat_flat, params):
    bs, n, _ = instance_feature.shape
    key_points = key_points_generator(anchor, instance_feature,
                                      params['kps_w'], params['kps_b'])       # [bs,n,P,3]
    # per-level continuous sampling coordinates (x*W-0.5, y*H-0.5), precomputed once so the
    # kernel only does the triangle-weight math; layout is point-major inside each anchor tile.
    x_min, y_min, _, x_max, y_max, _ = CAV_LIDAR_RANGE
    px = (key_points[..., 0] - x_min) / (x_max - x_min)                       # [bs,n,P]
    py = (key_points[..., 1] - y_min) / (y_max - y_min)
    cols = []
    for (h, w) in LEVEL_SHAPES:
        cols.append(px * w - 0.5)
        cols.append(py * h - 0.5)
    coords = jnp.stack(cols, axis=-1)                                         # [bs,n,P,2L]
    n_tiles = n // ANCHOR_TILE
    coords = coords.reshape(bs, n_tiles, ANCHOR_TILE, NUM_PTS, 2 * NUM_LEVELS)
    coords = coords.transpose(0, 1, 3, 2, 4).reshape(bs, n * NUM_PTS, 2 * NUM_LEVELS)
    return fused_forward(instance_feature, anchor_embed, coords, feat_flat, params)


def permute_weights_fc(wfc_w, wfc_b):
    """Reorder weights_fc columns from (l*P+p)*G + g to p*(L*G) + l*G + g (once, at setup).

    In the permuted layout a query's key-point block is a contiguous LG-column slice and the
    softmax group is simply column % G (what the roll-based group reduce needs)."""
    c = jnp.arange(DW)
    p = c // LG
    l = (c // NUM_GROUPS) % NUM_LEVELS
    g = c % NUM_GROUPS
    orig = (l * NUM_PTS + p) * NUM_GROUPS + g       # num_cams == 1
    return wfc_w[:, orig], wfc_b[orig].reshape(1, DW)


# ============================ pure-JAX reference ============================
def reference_forward(instance_feature, anchor, anchor_embed, feature_maps, params):
    bs, n, d = instance_feature.shape
    key_points = key_points_generator(anchor, instance_feature,
                                      params['kps_w'], params['kps_b'])
    feat = instance_feature + anchor_embed
    logits = feat @ params['wfc_w'] + params['wfc_b']
    wts = jax.nn.softmax(logits.reshape(bs, n, CLP, NUM_GROUPS), axis=2)
    wts = wts.reshape(bs, n, NUM_CAMS, NUM_LEVELS, NUM_PTS, NUM_GROUPS)
    wts = wts.transpose(0, 1, 4, 2, 3, 5).reshape(
        bs, n * NUM_PTS, NUM_CAMS, NUM_LEVELS, NUM_GROUPS)
    pts = key_points[..., :2].reshape(bs, n * NUM_PTS, NUM_CAMS, 2)
    x_min, y_min, _, x_max, y_max, _ = CAV_LIDAR_RANGE
    px = (pts[..., 0, 0] - x_min) / (x_max - x_min)
    py = (pts[..., 0, 1] - y_min) / (y_max - y_min)

    q = n * NUM_PTS
    out = jnp.zeros((bs, q, d), jnp.float32)
    bidx = jnp.arange(bs)[:, None]
    for lvl, fm in enumerate(feature_maps):
        hl, wl = fm.shape[-2:]
        fflat = jnp.transpose(fm[:, 0], (0, 2, 3, 1)).reshape(bs, hl * wl, d)
        x = px * wl - 0.5
        y = py * hl - 0.5
        x0 = jnp.floor(x).astype(jnp.int32)
        y0 = jnp.floor(y).astype(jnp.int32)
        lx = x - x0
        ly = y - y0

        def corner(yc, xc, wgt):
            valid = ((yc >= 0) & (yc < hl) & (xc >= 0) & (xc < wl)).astype(jnp.float32)
            idx = jnp.clip(yc, 0, hl - 1) * wl + jnp.clip(xc, 0, wl - 1)
            return fflat[bidx, idx] * (wgt * valid)[..., None]

        samp = (corner(y0, x0, (1 - ly) * (1 - lx)) + corner(y0, x0 + 1, (1 - ly) * lx)
                + corner(y0 + 1, x0, ly * (1 - lx)) + corner(y0 + 1, x0 + 1, ly * lx))
        w_l = wts[:, :, 0, lvl, :]
        out = out + samp * jnp.repeat(w_l, GROUP_DIMS, axis=-1)

    feats = out.reshape(bs, n, NUM_PTS, d).sum(axis=2)
    proj = feats @ params['out_w'] + params['out_b']
    return proj + instance_feature


# ==================================== main ====================================
if __name__ == "__main__":
    key = jax.random.PRNGKey(0)
    ks = jax.random.split(key, 12)
    d = EMBED_DIMS

    params = {
        'wfc_w': 0.02 * jax.random.normal(ks[0], (d, DW), jnp.float32),
        'wfc_b': 0.02 * jax.random.normal(ks[1], (DW,), jnp.float32),
        'out_w': 0.10 * jax.random.normal(ks[2], (d, d), jnp.float32),
        'out_b': 0.02 * jax.random.normal(ks[3], (d,), jnp.float32),
        'kps_w': 0.10 * jax.random.normal(ks[4], (d, NUM_LEARNABLE_PTS * 3), jnp.float32),
        'kps_b': jnp.zeros((NUM_LEARNABLE_PTS * 3,), jnp.float32),
    }
    # one-time (outside jit) column permutation of weights_fc for the fused kernel
    params['wfc_w_perm'], params['wfc_b_perm'] = permute_weights_fc(
        params['wfc_w'], params['wfc_b'])

    instance_feature = jax.random.normal(ks[5], (BS, NUM_ANCHOR, d), jnp.float32)
    anchor_embed = jax.random.normal(ks[6], (BS, NUM_ANCHOR, d), jnp.float32)
    xyz = jax.random.uniform(ks[7], (BS, NUM_ANCHOR, 3),
                             minval=jnp.array([-120.0, -35.0, -2.0]),
                             maxval=jnp.array([120.0, 35.0, 0.5]))
    sizes = jnp.log(jnp.array([4.0, 2.0, 1.5])) * jnp.ones((BS, NUM_ANCHOR, 3))
    yaw = jax.random.uniform(ks[8], (BS, NUM_ANCHOR, 1), minval=0.0, maxval=6.28)
    vel = jnp.zeros((BS, NUM_ANCHOR, 3), jnp.float32)
    # anchor layout: [x, y, z, log_w, log_l, log_h, sin_yaw, cos_yaw, vx, vy, vz]
    anchor = jnp.concatenate(
        [xyz, sizes, jnp.sin(yaw), jnp.cos(yaw), vel], axis=-1).astype(jnp.float32)

    feature_maps = [
        jax.random.normal(ks[9 + i], (BS, NUM_CAMS, d, h, w), jnp.float32)
        for i, (h, w) in enumerate(LEVEL_SHAPES)
    ]

    # layout prep (flatten + bf16 cast) done once, outside the per-call hot path
    feat_flat = prepare_feature_maps(feature_maps)

    fwd = jax.jit(lidar_deformable_feature_aggregation)
    out = fwd(instance_feature, anchor, anchor_embed, feat_flat, params)
    out = jax.block_until_ready(out)

    ref = reference_forward(instance_feature, anchor, anchor_embed, feature_maps, params)
    assert out.shape == (BS, NUM_ANCHOR, EMBED_DIMS)
    # tolerance covers the bf16 feature-sampling matmul (typ. ~1e-3 abs vs the f32 reference);
    # the softmax reciprocal is Newton-refined so it no longer contributes visible error.
    err = float(jnp.max(jnp.abs(out - ref)))
    assert err < 2e-2, err

    print("KERNEL_OK")
</pallas_src>

<mosaic_0001>
module attributes {stable_mosaic.version = 11 : i64} {
  func.func @_fused_kernel(%arg0: i32, %arg1: i32, %arg2: memref<1x8x32xf32, #tpu.memory_space<vmem>>, %arg3: memref<1x8x32xf32, #tpu.memory_space<vmem>>, %arg4: memref<1x64x4xf32, #tpu.memory_space<vmem>>, %arg5: memref<1x320x32xbf16, #tpu.memory_space<vmem>>, %arg6: memref<2x320xf32, #tpu.memory_space<vmem>>, %arg7: memref<32x128xf32, #tpu.memory_space<vmem>>, %arg8: memref<1x128xf32, #tpu.memory_space<vmem>>, %arg9: memref<32x32xf32, #tpu.memory_space<vmem>>, %arg10: memref<1x32xf32, #tpu.memory_space<vmem>>, %arg11: memref<64x8xf32, #tpu.memory_space<vmem>>, %arg12: memref<64x128xf32, #tpu.memory_space<vmem>>, %arg13: memref<128x64xf32, #tpu.memory_space<vmem>>, %arg14: memref<1x8x32xf32, #tpu.memory_space<vmem>>) attributes {dimension_semantics = [#tpu.dimension_semantics<parallel>, #tpu.dimension_semantics<parallel>], iteration_bounds = array<i64: 2, 2>, scalar_prefetch = 0 : i64, scratch_operands = 0 : i64, tpu.core_type = #tpu.core_type<tc>, window_params = [{transform_indices = @transform_0, window_bounds = array<i64: 1, 8, 32>}, {transform_indices = @transform_1, window_bounds = array<i64: 1, 8, 32>}, {transform_indices = @transform_2, window_bounds = array<i64: 1, 64, 4>}, {transform_indices = @transform_3, window_bounds = array<i64: 1, 320, 32>}, {pipeline_mode = #tpu.pipeline_mode<synchronous>, transform_indices = @transform_4, window_bounds = array<i64: 2, 320>}, {pipeline_mode = #tpu.pipeline_mode<synchronous>, transform_indices = @transform_5, window_bounds = array<i64: 32, 128>}, {pipeline_mode = #tpu.pipeline_mode<synchronous>, transform_indices = @transform_6, window_bounds = array<i64: 1, 128>}, {pipeline_mode = #tpu.pipeline_mode<synchronous>, transform_indices = @transform_7, window_bounds = array<i64: 32, 32>}, {pipeline_mode = #tpu.pipeline_mode<synchronous>, transform_indices = @transform_8, window_bounds = array<i64: 1, 32>}, {pipeline_mode = #tpu.pipeline_mode<synchronous>, transform_indices = @transform_9, window_bounds = array<i64: 64, 8>}, {pipeline_mode = #tpu.pipeline_mode<synchronous>, transform_indices = @transform_10, window_bounds = array<i64: 64, 128>}, {pipeline_mode = #tpu.pipeline_mode<synchronous>, transform_indices = @transform_11, window_bounds = array<i64: 128, 64>}, {transform_indices = @transform_12, window_bounds = array<i64: 1, 8, 32>}]} {
    %c0 = arith.constant 0 : index
    %c0_0 = arith.constant 0 : index
    %c0_1 = arith.constant 0 : index
    %0 = vector.load %arg2[%c0, %c0_0, %c0_1] : memref<1x8x32xf32, #tpu.memory_space<vmem>>, vector<1x8x32xf32>
    %1 = vector.shape_cast %0 : vector<1x8x32xf32> to vector<8x32xf32>
    %c0_2 = arith.constant 0 : index
    %c0_3 = arith.constant 0 : index
    %c0_4 = arith.constant 0 : index
    %2 = vector.load %arg3[%c0_2, %c0_3, %c0_4] : memref<1x8x32xf32, #tpu.memory_space<vmem>>, vector<1x8x32xf32>
    %3 = vector.shape_cast %2 : vector<1x8x32xf32> to vector<8x32xf32>
    %c0_5 = arith.constant 0 : index
    %c0_6 = arith.constant 0 : index
    %c0_7 = arith.constant 0 : index
    %4 = vector.load %arg4[%c0_5, %c0_6, %c0_7] : memref<1x64x4xf32, #tpu.memory_space<vmem>>, vector<1x64x4xf32>
    %5 = vector.shape_cast %4 : vector<1x64x4xf32> to vector<64x4xf32>
    %6 = arith.addf %1, %3 : vector<8x32xf32>
    %c0_8 = arith.constant 0 : index
    %c0_9 = arith.constant 0 : index
    %7 = vector.load %arg7[%c0_8, %c0_9] : memref<32x128xf32, #tpu.memory_space<vmem>>, vector<32x128xf32>
    %cst = arith.constant dense<0.000000e+00> : vector<8x128xf32>
    %8 = tpu.matmul %6, %7, %cst {dimension_numbers = #tpu.dot_dimension_numbers<[1], [0], [0], [1], [0, 0, 1, 1], [], []>} : vector<8x32xf32>, vector<32x128xf32>, vector<8x128xf32> -> vector<8x128xf32>
    %c0_10 = arith.constant 0 : index
    %c0_11 = arith.constant 0 : index
    %9 = vector.load %arg8[%c0_10, %c0_11] : memref<1x128xf32, #tpu.memory_space<vmem>>, vector<1x128xf32>
    %10 = vector.broadcast %9 : vector<1x128xf32> to vector<8x128xf32>
    %11 = arith.addf %8, %10 : vector<8x128xf32>
    %c8_i32 = arith.constant 8 : i32
    %12 = tpu.dynamic_rotate %11 by %c8_i32 dim 1 : vector<8x128xf32>, i32 -> vector<8x128xf32>
    %13 = arith.maximumf %11, %12 : vector<8x128xf32>
    %c16_i32 = arith.constant 16 : i32
    %14 = tpu.dynamic_rotate %13 by %c16_i32 dim 1 : vector<8x128xf32>, i32 -> vector<8x128xf32>
    %15 = arith.maximumf %13, %14 : vector<8x128xf32>
    %c32_i32 = arith.constant 32 : i32
    %16 = tpu.dynamic_rotate %15 by %c32_i32 dim 1 : vector<8x128xf32>, i32 -> vector<8x128xf32>
    %17 = arith.maximumf %15, %16 : vector<8x128xf32>
    %c64_i32 = arith.constant 64 : i32
    %18 = tpu.dynamic_rotate %17 by %c64_i32 dim 1 : vector<8x128xf32>, i32 -> vector<8x128xf32>
    %19 = arith.maximumf %17, %18 : vector<8x128xf32>
    %20 = arith.subf %11, %19 : vector<8x128xf32>
    %21 = math.exp %20 : vector<8x128xf32>
    %c8_i32_12 = arith.constant 8 : i32
    %22 = tpu.dynamic_rotate %21 by %c8_i32_12 dim 1 : vector<8x128xf32>, i32 -> vector<8x128xf32>
    %23 = arith.addf %21, %22 : vector<8x128xf32>
    %c16_i32_13 = arith.constant 16 : i32
    %24 = tpu.dynamic_rotate %23 by %c16_i32_13 dim 1 : vector<8x128xf32>, i32 -> vector<8x128xf32>
    %25 = arith.addf %23, %24 : vector<8x128xf32>
    %c32_i32_14 = arith.constant 32 : i32
    %26 = tpu.dynamic_rotate %25 by %c32_i32_14 dim 1 : vector<8x128xf32>, i32 -> vector<8x128xf32>
    %27 = arith.addf %25, %26 : vector<8x128xf32>
    %c64_i32_15 = arith.constant 64 : i32
    %28 = tpu.dynamic_rotate %27 by %c64_i32_15 dim 1 : vector<8x128xf32>, i32 -> vector<8x128xf32>
    %29 = arith.addf %27, %28 : vector<8x128xf32>
    %30 = tpu.reciprocal %29 {approx = true} : vector<8x128xf32> -> vector<8x128xf32>
    %31 = arith.mulf %29, %30 : vector<8x128xf32>
    %cst_16 = arith.constant 2.000000e+00 : f32
    %32 = vector.broadcast %cst_16 : f32 to vector<8x128xf32>
    %33 = arith.subf %32, %31 : vector<8x128xf32>
    %34 = arith.mulf %30, %33 : vector<8x128xf32>
    %35 = arith.mulf %21, %34 : vector<8x128xf32>
    %c0_17 = arith.constant 0 : index
    %c0_18 = arith.constant 0 : index
    %36 = vector.load %arg11[%c0_17, %c0_18] : memref<64x8xf32, #tpu.memory_space<vmem>>, vector<64x8xf32>
    %cst_19 = arith.constant dense<0.000000e+00> : vector<64x128xf32>
    %37 = tpu.matmul %36, %35, %cst_19 {dimension_numbers = #tpu.dot_dimension_numbers<[1], [0], [0], [1], [0, 0, 1, 1], [], []>} : vector<64x8xf32>, vector<8x128xf32>, vector<64x128xf32> -> vector<64x128xf32>
    %c0_20 = arith.constant 0 : index
    %c0_21 = arith.constant 0 : index
    %38 = vector.load %arg12[%c0_20, %c0_21] : memref<64x128xf32, #tpu.memory_space<vmem>>, vector<64x128xf32>
    %39 = arith.mulf %37, %38 : vector<64x128xf32>
    %c0_22 = arith.constant 0 : index
    %c0_23 = arith.constant 0 : index
    %40 = vector.load %arg13[%c0_22, %c0_23] : memref<128x64xf32, #tpu.memory_space<vmem>>, vector<128x64xf32>
    %cst_24 = arith.constant dense<0.000000e+00> : vector<64x64xf32>
    %41 = tpu.matmul %39, %40, %cst_24 {dimension_numbers = #tpu.dot_dimension_numbers<[1], [0], [0], [1], [0, 0, 1, 1], [], []>} : vector<64x128xf32>, vector<128x64xf32>, vector<64x64xf32> -> vector<64x64xf32>
    %cst_25 = arith.constant 0.000000e+00 : f32
    %42 = vector.broadcast %cst_25 : f32 to vector<64x32xf32>
    %43 = vector.extract_strided_slice %5 {offsets = [0, 0], sizes = [64, 1], strides = [1, 1]} : vector<64x4xf32> to vector<64x1xf32>
    %44 = vector.extract_strided_slice %5 {offsets = [0, 1], sizes = [64, 1], strides = [1, 1]} : vector<64x4xf32> to vector<64x1xf32>
    %c0_26 = arith.constant 0 : index
    %c0_27 = arith.constant 0 : index
    %45 = vector.load %arg6[%c0_26, %c0_27] : memref<2x320xf32, #tpu.memory_space<vmem>>, vector<1x256xf32>
    %c1 = arith.constant 1 : index
    %c0_28 = arith.constant 0 : index
    %46 = vector.load %arg6[%c1, %c0_28] : memref<2x320xf32, #tpu.memory_space<vmem>>, vector<1x256xf32>
    %47 = vector.broadcast %45 : vector<1x256xf32> to vector<64x256xf32>
    %48 = vector.broadcast %43 : vector<64x1xf32> to vector<64x256xf32>
    %49 = arith.subf %47, %48 : vector<64x256xf32>
    %50 = math.absf %49 : vector<64x256xf32>
    %cst_29 = arith.constant 1.000000e+00 : f32
    %51 = vector.broadcast %cst_29 : f32 to vector<64x256xf32>
    %52 = arith.subf %51, %50 : vector<64x256xf32>
    %cst_30 = arith.constant 0.000000e+00 : f32
    %53 = vector.broadcast %cst_30 : f32 to vector<64x256xf32>
    %54 = arith.maximumf %52, %53 : vector<64x256xf32>
    %55 = vector.broadcast %46 : vector<1x256xf32> to vector<64x256xf32>
    %56 = vector.broadcast %44 : vector<64x1xf32> to vector<64x256xf32>
    %57 = arith.subf %55, %56 : vector<64x256xf32>
    %58 = math.absf %57 : vector<64x256xf32>
    %cst_31 = arith.constant 1.000000e+00 : f32
    %59 = vector.broadcast %cst_31 : f32 to vector<64x256xf32>
    %60 = arith.subf %59, %58 : vector<64x256xf32>
    %cst_32 = arith.constant 0.000000e+00 : f32
    %61 = vector.broadcast %cst_32 : f32 to vector<64x256xf32>
    %62 = arith.maximumf %60, %61 : vector<64x256xf32>
    %63 = arith.mulf %62, %54 : vector<64x256xf32>
    %64 = arith.truncf %63 : vector<64x256xf32> to vector<64x256xbf16>
    %c0_33 = arith.constant 0 : index
    %c0_34 = arith.constant 0 : index
    %c0_35 = arith.constant 0 : index
    %65 = vector.load %arg5[%c0_33, %c0_34, %c0_35] : memref<1x320x32xbf16, #tpu.memory_space<vmem>>, vector<1x256x32xbf16>
    %66 = vector.shape_cast %65 : vector<1x256x32xbf16> to vector<256x32xbf16>
    %cst_36 = arith.constant dense<0.000000e+00> : vector<64x32xf32>
    %67 = tpu.matmul %64, %66, %cst_36 {dimension_numbers = #tpu.dot_dimension_numbers<[1], [0], [0], [1], [0, 0, 1, 1], [], []>} : vector<64x256xbf16>, vector<256x32xbf16>, vector<64x32xf32> -> vector<64x32xf32>
    %68 = vector.extract_strided_slice %41 {offsets = [0, 0], sizes = [64, 32], strides = [1, 1]} : vector<64x64xf32> to vector<64x32xf32>
    %69 = arith.mulf %67, %68 : vector<64x32xf32>
    %70 = arith.addf %42, %69 : vector<64x32xf32>
    %71 = vector.extract_strided_slice %5 {offsets = [0, 2], sizes = [64, 1], strides = [1, 1]} : vector<64x4xf32> to vector<64x1xf32>
    %72 = vector.extract_strided_slice %5 {offsets = [0, 3], sizes = [64, 1], strides = [1, 1]} : vector<64x4xf32> to vector<64x1xf32>
    %c0_37 = arith.constant 0 : index
    %c256 = arith.constant 256 : index
    %73 = vector.load %arg6[%c0_37, %c256] : memref<2x320xf32, #tpu.memory_space<vmem>>, vector<1x64xf32>
    %c1_38 = arith.constant 1 : index
    %c256_39 = arith.constant 256 : index
    %74 = vector.load %arg6[%c1_38, %c256_39] : memref<2x320xf32, #tpu.memory_space<vmem>>, vector<1x64xf32>
    %75 = vector.broadcast %73 : vector<1x64xf32> to vector<64x64xf32>
    %76 = vector.broadcast %71 : vector<64x1xf32> to vector<64x64xf32>
    %77 = arith.subf %75, %76 : vector<64x64xf32>
    %78 = math.absf %77 : vector<64x64xf32>
    %cst_40 = arith.constant 1.000000e+00 : f32
    %79 = vector.broadcast %cst_40 : f32 to vector<64x64xf32>
    %80 = arith.subf %79, %78 : vector<64x64xf32>
    %cst_41 = arith.constant 0.000000e+00 : f32
    %81 = vector.broadcast %cst_41 : f32 to vector<64x64xf32>
    %82 = arith.maximumf %80, %81 : vector<64x64xf32>
    %83 = vector.broadcast %74 : vector<1x64xf32> to vector<64x64xf32>
    %84 = vector.broadcast %72 : vector<64x1xf32> to vector<64x64xf32>
    %85 = arith.subf %83, %84 : vector<64x64xf32>
    %86 = math.absf %85 : vector<64x64xf32>
    %cst_42 = arith.constant 1.000000e+00 : f32
    %87 = vector.broadcast %cst_42 : f32 to vector<64x64xf32>
    %88 = arith.subf %87, %86 : vector<64x64xf32>
    %cst_43 = arith.constant 0.000000e+00 : f32
    %89 = vector.broadcast %cst_43 : f32 to vector<64x64xf32>
    %90 = arith.maximumf %88, %89 : vector<64x64xf32>
    %91 = arith.mulf %90, %82 : vector<64x64xf32>
    %92 = arith.truncf %91 : vector<64x64xf32> to vector<64x64xbf16>
    %c0_44 = arith.constant 0 : index
    %c256_45 = arith.constant 256 : index
    %c0_46 = arith.constant 0 : index
    %93 = vector.load %arg5[%c0_44, %c256_45, %c0_46] : memref<1x320x32xbf16, #tpu.memory_space<vmem>>, vector<1x64x32xbf16>
    %94 = vector.shape_cast %93 : vector<1x64x32xbf16> to vector<64x32xbf16>
    %cst_47 = arith.constant dense<0.000000e+00> : vector<64x32xf32>
    %95 = tpu.matmul %92, %94, %cst_47 {dimension_numbers = #tpu.dot_dimension_numbers<[1], [0], [0], [1], [0, 0, 1, 1], [], []>} : vector<64x64xbf16>, vector<64x32xbf16>, vector<64x32xf32> -> vector<64x32xf32>
    %96 = vector.extract_strided_slice %41 {offsets = [0, 32], sizes = [64, 32], strides = [1, 1]} : vector<64x64xf32> to vector<64x32xf32>
    %97 = arith.mulf %95, %96 : vector<64x32xf32>
    %98 = arith.addf %70, %97 : vector<64x32xf32>
    %99 = vector.extract_strided_slice %98 {offsets = [0, 0], sizes = [8, 32], strides = [1, 1]} : vector<64x32xf32> to vector<8x32xf32>
    %100 = vector.extract_strided_slice %98 {offsets = [8, 0], sizes = [8, 32], strides = [1, 1]} : vector<64x32xf32> to vector<8x32xf32>
    %101 = arith.addf %99, %100 : vector<8x32xf32>
    %102 = vector.extract_strided_slice %98 {offsets = [16, 0], sizes = [8, 32], strides = [1, 1]} : vector<64x32xf32> to vector<8x32xf32>
    %103 = arith.addf %101, %102 : vector<8x32xf32>
    %104 = vector.extract_strided_slice %98 {offsets = [24, 0], sizes = [8, 32], strides = [1, 1]} : vector<64x32xf32> to vector<8x32xf32>
    %105 = arith.addf %103, %104 : vector<8x32xf32>
    %106 = vector.extract_strided_slice %98 {offsets = [32, 0], sizes = [8, 32], strides = [1, 1]} : vector<64x32xf32> to vector<8x32xf32>
    %107 = arith.addf %105, %106 : vector<8x32xf32>
    %108 = vector.extract_strided_slice %98 {offsets = [40, 0], sizes = [8, 32], strides = [1, 1]} : vector<64x32xf32> to vector<8x32xf32>
    %109 = arith.addf %107, %108 : vector<8x32xf32>
    %110 = vector.extract_strided_slice %98 {offsets = [48, 0], sizes = [8, 32], strides = [1, 1]} : vector<64x32xf32> to vector<8x32xf32>
    %111 = arith.addf %109, %110 : vector<8x32xf32>
    %112 = vector.extract_strided_slice %98 {offsets = [56, 0], sizes = [8, 32], strides = [1, 1]} : vector<64x32xf32> to vector<8x32xf32>
    %113 = arith.addf %111, %112 : vector<8x32xf32>
    %c0_48 = arith.constant 0 : index
    %c0_49 = arith.constant 0 : index
    %114 = vector.load %arg9[%c0_48, %c0_49] : memref<32x32xf32, #tpu.memory_space<vmem>>, vector<32x32xf32>
    %cst_50 = arith.constant dense<0.000000e+00> : vector<8x32xf32>
    %115 = tpu.matmul %113, %114, %cst_50 {dimension_numbers = #tpu.dot_dimension_numbers<[1], [0], [0], [1], [0, 0, 1, 1], [], []>} : vector<8x32xf32>, vector<32x32xf32>, vector<8x32xf32> -> vector<8x32xf32>
    %c0_51 = arith.constant 0 : index
    %c0_52 = arith.constant 0 : index
    %116 = vector.load %arg10[%c0_51, %c0_52] : memref<1x32xf32, #tpu.memory_space<vmem>>, vector<1x32xf32>
    %117 = vector.broadcast %116 : vector<1x32xf32> to vector<8x32xf32>
    %118 = arith.addf %115, %117 : vector<8x32xf32>
    %119 = arith.addf %118, %1 : vector<8x32xf32>
    %c0_53 = arith.constant 0 : index
    %c0_54 = arith.constant 0 : index
    %c0_55 = arith.constant 0 : index
    %120 = vector.load %arg14[%c0_53, %c0_54, %c0_55] : memref<1x8x32xf32, #tpu.memory_space<vmem>>, vector<1x8x32xf32>
    %121 = vector.shape_cast %120 : vector<1x8x32xf32> to vector<8x32xf32>
    %122 = vector.shape_cast %119 : vector<8x32xf32> to vector<1x8x32xf32>
    tpu.vector_store %arg14[%c0_53, %c0_54, %c0_55], %122 {strides = array<i32>} : memref<1x8x32xf32, #tpu.memory_space<vmem>>, vector<1x8x32xf32>,
    return
  }
  func.func @transform_0(%arg0: i32, %arg1: i32) -> (i32, i32, i32) {
    %c0_i32 = arith.constant 0 : i32
    %c0_i32_0 = arith.constant 0 : i32
    return %arg0, %arg1, %c0_i32 : i32, i32, i32
  }
  func.func @transform_1(%arg0: i32, %arg1: i32) -> (i32, i32, i32) {
    %c0_i32 = arith.constant 0 : i32
    %c0_i32_0 = arith.constant 0 : i32
    return %arg0, %arg1, %c0_i32 : i32, i32, i32
  }
  func.func @transform_2(%arg0: i32, %arg1: i32) -> (i32, i32, i32) {
    %c0_i32 = arith.constant 0 : i32
    %c0_i32_0 = arith.constant 0 : i32
    return %arg0, %arg1, %c0_i32 : i32, i32, i32
  }
  func.func @transform_3(%arg0: i32, %arg1: i32) -> (i32, i32, i32) {
    %c0_i32 = arith.constant 0 : i32
    %c0_i32_0 = arith.constant 0 : i32
    %c0_i32_1 = arith.constant 0 : i32
    return %arg0, %c0_i32, %c0_i32_0 : i32, i32, i32
  }
  func.func @transform_4(%arg0: i32, %arg1: i32) -> (i32, i32) {
    %c0_i32 = arith.constant 0 : i32
    %c0_i32_0 = arith.constant 0 : i32
    %c0_i32_1 = arith.constant 0 : i32
    return %c0_i32, %c0_i32_0 : i32, i32
  }
  func.func @transform_5(%arg0: i32, %arg1: i32) -> (i32, i32) {
    %c0_i32 = arith.constant 0 : i32
    %c0_i32_0 = arith.constant 0 : i32
    %c0_i32_1 = arith.constant 0 : i32
    return %c0_i32, %c0_i32_0 : i32, i32
  }
  func.func @transform_6(%arg0: i32, %arg1: i32) -> (i32, i32) {
    %c0_i32 = arith.constant 0 : i32
    %c0_i32_0 = arith.constant 0 : i32
    %c0_i32_1 = arith.constant 0 : i32
    return %c0_i32, %c0_i32_0 : i32, i32
  }
  func.func @transform_7(%arg0: i32, %arg1: i32) -> (i32, i32) {
    %c0_i32 = arith.constant 0 : i32
    %c0_i32_0 = arith.constant 0 : i32
    %c0_i32_1 = arith.constant 0 : i32
    return %c0_i32, %c0_i32_0 : i32, i32
  }
  func.func @transform_8(%arg0: i32, %arg1: i32) -> (i32, i32) {
    %c0_i32 = arith.constant 0 : i32
    %c0_i32_0 = arith.constant 0 : i32
    %c0_i32_1 = arith.constant 0 : i32
    return %c0_i32, %c0_i32_0 : i32, i32
  }
  func.func @transform_9(%arg0: i32, %arg1: i32) -> (i32, i32) {
    %c0_i32 = arith.constant 0 : i32
    %c0_i32_0 = arith.constant 0 : i32
    %c0_i32_1 = arith.constant 0 : i32
    return %c0_i32, %c0_i32_0 : i32, i32
  }
  func.func @transform_10(%arg0: i32, %arg1: i32) -> (i32, i32) {
    %c0_i32 = arith.constant 0 : i32
    %c0_i32_0 = arith.constant 0 : i32
    %c0_i32_1 = arith.constant 0 : i32
    return %c0_i32, %c0_i32_0 : i32, i32
  }
  func.func @transform_11(%arg0: i32, %arg1: i32) -> (i32, i32) {
    %c0_i32 = arith.constant 0 : i32
    %c0_i32_0 = arith.constant 0 : i32
    %c0_i32_1 = arith.constant 0 : i32
    return %c0_i32, %c0_i32_0 : i32, i32
  }
  func.func @transform_12(%arg0: i32, %arg1: i32) -> (i32, i32, i32) {
    %c0_i32 = arith.constant 0 : i32
    %c0_i32_0 = arith.constant 0 : i32
    return %arg0, %arg1, %c0_i32 : i32, i32, i32
  }
}

</mosaic_0001>

<bundles_post_ra>
// kernel: lidar_deformable_feature_aggregation.1
= control target key start
LH: loop header
LB: loop body
LE: loop exit
PB: predicated region body
PF: predicated region fallthrough
CT: control target
= control target key end

     0   :  { %s2946_s0 = inlined_call_operand.vmem [shape: f32[2,16,32], index: 0, kind: input, shape index: {}]   ;;  %s2947_s1 = inlined_call_operand.vmem [shape: f32[2,16,32], index: 1, kind: input, shape index: {}]   ;;  %s2948_s2 = inlined_call_operand.vmem [shape: f32[2,128,4], index: 2, kind: input, shape index: {}]   ;;  %s2949_s3 = inlined_call_operand.vmem [shape: bf16[2,320,32], index: 3, kind: input, shape index: {}]   ;;  %s2950_s4 = inlined_call_operand.vmem [shape: f32[2,320], index: 4, kind: input, shape index: {}]   ;;  %s2951_s5 = inlined_call_operand.vmem [shape: f32[32,128], index: 5, kind: input, shape index: {}]   ;;  %s2952_s6 = inlined_call_operand.vmem [shape: f32[1,128], index: 6, kind: input, shape index: {}]   ;;  %s2953_s7 = inlined_call_operand.vmem [shape: f32[32,32], index: 7, kind: input, shape index: {}]   ;;  %s2954_s8 = inlined_call_operand.vmem [shape: f32[1,32], index: 8, kind: input, shape index: {}]   ;;  %s2955_s9 = inlined_call_operand.vmem [shape: f32[64,8], index: 9, kind: input, shape index: {}]   ;;  %s2956_s10 = inlined_call_operand.vmem [shape: f32[64,128], index: 10, kind: input, shape index: {}]   ;;  %s2957_s11 = inlined_call_operand.vmem [shape: f32[128,64], index: 11, kind: input, shape index: {}]   ;;  %s2958_s12 = inlined_call_operand.hbm [shape: f32[2,16,32], index: 12, kind: output, shape index: {}]  }
   0x1   :  { %2969 = sst [smem:[#allocation14_spill]] %s2958_s12 }
   0x2   :  { %17 = vsyncpa [#allocation3], 0 }
   0x3   :  { %19 = vsyncpa [#allocation3 + $0x1], 0  ;;  %s2476_s21 = smov 0   ;;  %s2478_s22 = smov 0  }
   0x4   :  { %s2480_s23 = smov 0   ;;  %s2482_s24 = smov 0  }
   0x5   :  { %s2484_s25 = smov 0   ;;  %s2486_s26 = smov 0  }
   0x6   :  { %s2488_s27 = smov 0   ;;  %s2490_s28 = smov 0  }
   0x7 LB: > { %2970 = sst [smem:[#allocation5_spill]] %s2369_s21  ;;  %s1929_s29 = sadd.s32 4294967295, %s2397_s28   ;;  %s2397_s28 = sphi %s2490_s28, %s25_s28   ;;  %s2393_s27 = sphi %s2488_s27, %s2991_s27   ;;  %s2389_s26 = sphi %s2486_s26, %s2990_s26   ;;  %s2385_s25 = sphi %s2484_s25, %s2989_s25   ;;  %s2381_s24 = sphi %s2482_s24, %s2988_s24   ;;  %s2377_s23 = sphi %s2480_s23, %s2987_s23   ;;  %s2373_s22 = sphi %s2478_s22, %s2993_s22   ;;  %s2369_s21 = sphi %s2476_s21, %s2992_s21  }
   0x8   : > { %2971 = sst [smem:[#allocation6_spill]] %s2377_s23  ;;  %s1930_s30 = sadd.s32 4294967294, %s2397_s28  }
   0x9   : > { %2972 = sst [smem:[#allocation7_spill]] %s2389_s26  ;;  %s34_s13 = sadd.s32 1, %s2389_s26 }
   0xa   : > { %2973 = sst [smem:[#allocation8_spill]] %s2393_s27  ;;  %p35_p0 = scmp.ge.s32.totalorder %s34_s13, 2 }
   0xb   : > { %2974 = sst [smem:[#allocation9_spill]] %s2397_s28  ;;  %s37_s14 = sadd.s32 1, %s2393_s27 }
   0xc   : > { %p334_p1 = scmp.ne.s32.totalorder %s2377_s23, %s2373_s22  ;;  %p335_p2 = scmp.eq.s32.totalorder %s1929_s29, 3 }
   0xd   : > { %s2995_s13 = smov (%p35_p0, %s34_s13), 0  ;;  %s2997_s14 = smov (!%p35_p0, %s37_s14), %s2393_s27 }
   0xe   : > { %2975 = sst [smem:[#allocation10_spill]] %s2995_s13  ;;  %s320_s15 = ssub.s32 %s2389_s26, %s2995_s13 }
   0xf   : > { %p2527_p3 = por %p335_p2, %p334_p1  ;;  %p39_p4 = scmp.ge.s32.totalorder %s2997_s14, 2 }
  0x10   : > { %p340_p5 = scmp.ne.s32.totalorder %s2373_s22, %s2369_s21  ;;  %p341_p6 = scmp.eq.s32.totalorder %s1930_s30, 3 }
  0x11   : > { %p1933_p7 = scmp.ge.s32.totalorder %s2397_s28, 1  ;;  %s2999_s14 = smov (%p39_p4, %s2997_s14), 0 }
  0x12   : > { %2977 = sst [smem:[#allocation11_spill]] %s2999_s14  ;;  %p2536_p8 = por %p341_p6, %p340_p5 }
  0x13   : > { %p426_p9 = scmp.lt.s32.totalorder %s2397_s28, 5  ;;  %s319_s18 = ssub.s32 %s2393_s27, %s2999_s14 }
  0x14   : > { %s2978_s17 = scalar_select %p2536_p8, 1, 0 }
  0x15   : > { %s324_s19 = sadd.s32 1, %s2377_s23  ;;  %s321_s20 = sor.u32 %s320_s15, %s319_s18 }
  0x16   : > { %2979 = sst [smem:[#allocation12_spill]] %s2978_s17  ;;  %p427_p10 = pnand %p1933_p7, %p426_p9 }
  0x17   : > { %p322_p11 = scmp.eq.s32.totalorder %s321_s20, 0  ;;  %p493_p12 = scmp.lt.s32.totalorder (!%p427_p10), %s2385_s25, 1 }
  0x18   : > { %430 = sbr.rel (%p427_p10) target bundleno = 1950 (0x79e), region = 68  ;;  %p495_p13 = scmp.lt.s32.totalorder (!%p427_p10), %s2381_s24, 1 }
  0x19   : > { %s2545_s29 = scalar_select %p322_p11, %s2377_s23, %s324_s19  }
  0x1a   : > { %s2401_s21 = smov (!%p427_p10), 8   ;;  %s2402_s12 = smov (!%p427_p10), 16  }
  0x1b   : > { %2980 = sst [smem:[#allocation13_spill]] %s2545_s29 }
  0x1d   : > { %v539_v0 = vld [vmem:[%s2951_s5 + $0x18] sm:$0xff]  ;;  %v2399_v1 = vmov 0.0   ;;  %v538_v2 = vld [vmem:[%s2951_s5 + $0x10] sm:$0xff]  ;;  %vm2400_vm0 = vmmov 0   ;;  %s2559_s26 = scalar_select %p493_p12, %s2385_s25, 1  ;;  %v537_v3 = vld [vmem:[%s2951_s5 + $0x8] sm:$0xff]  ;;  %v932_v58 = vlaneseq }
  0x1e   : > { %2078 = vmatprep.subr.mxu0 %v2399_v1  ;;  %2086 = vmatprep.mubr.msk.f32.mxu0 %vm2400_vm0, %v2399_v1  ;;  %s496_s18 = scalar_select %p495_p13, %s2381_s24, 1  ;;  %v536_v4 = vld [vmem:[%s2951_s5] sm:$0xff]  ;;  %vm547_vm1 = vcmask 261120   ;;  %v2405_v25 = vmov 0   ;;  %v2406_v30 = vmov 1   ;;  %vm661_vm2 = vcmask 64512  }
  0x1f   : > { %2079 = vmatpush3.msra.mxu0 %v539_v0  ;;  %s1935_s14 = sshll.u32 %s2559_s26, 1  ;;  %s2174_s27 = smul.u32 160, %s2559_s26  ;;  %v1943_v8 = vld [vmem:[%s2952_s6] ss:$0 sm:$0xff]  ;;  %2258 = vset.pattern.permute.xlu1 %v2405_v25  ;;  %v2407_v37 = vmov 2   ;;  %v2408_v38 = vmov 3  }
  0x20   : > { %2080 = vmatprep.subr.mxu0 %v2399_v1  ;;  %s498_s30 = sadd.s32 %s1935_s14, %s496_s18  ;;  %2257 = vset.pattern.permute.xlu0 %v2405_v25  ;;  %s1940_s14 = sshll.u32 %s2559_s26, 4  ;;  %v653_v34 = vld [vmem:[%s2955_s9] sm:$0xff]  ;;  %v933_v59 = vshrl.u32 %v932_v58, 7  ;;  %vm1568_vm3 = vcmask 523264  }
  0x21   : > { %2081 = vmatpush3.msra.mxu0 %v538_v2  ;;  %s1936_s29 = sshll.u32 %s498_s30, 3  ;;  %s2584_s18 = scalar_lea.vmem %s2949_s3, %s2174_s27  ;;  %2091 = vmatprep.mubr.msk.f32.mxu1 %vm661_vm2, %v653_v34  ;;  %v1953_v63 = vld [vmem:[%s2950_s4 + $0x1] ss:$2 sm:$0x3] }
  0x22   : > { %2082 = vmatprep.subr.mxu0 %v2399_v1  ;;  %s2576_s13 = scalar_lea.vmem %s2946_s0, %s1936_s29  ;;  %s508_s28 = scalar_lea.vmem %s2947_s1, %s1936_s29  ;;  %v2280_v40 = vld [vmem:[%s2584_s18 + $0x78] sm:$0xff]   ;;  %v2282_v43 = vld [vmem:[%s2584_s18 + $0x70] sm:$0xff]   ;;  %v2284_v45 = vld [vmem:[%s2584_s18 + $0x68] sm:$0xff]   ;;  %v938_v61 = vsub.s32 1, %v933_v59  ;;  %v934_v2 = vsub.s32 0, %v933_v59 }
  0x23   : > { %2083 = vmatpush3.msra.mxu0 %v537_v3  ;;  %v525_v5 = vld [vmem:[%s2576_s13] sm:$0xff]  ;;  %s2403_s27 = smov 32   ;;  %s1939_s29 = sshll.u32 %s2381_s24, 3  ;;  %v2281_v41 = vld [vmem:[%s2584_s18 + $0x38] sm:$0xff]   ;;  %v2283_v44 = vld [vmem:[%s2584_s18 + $0x30] sm:$0xff]  }
  0x24   : > { %2084 = vmatprep.subr.mxu0 %v2399_v1  ;;  %v526_v6 = vld [vmem:[%s508_s28] sm:$0xff]  ;;  %s2404_s28 = smov 64   ;;  %p512_p0 = scmp.lt.s32.totalorder %s1939_s29, 15  ;;  %v2285_v46 = vld [vmem:[%s2584_s18 + $0x28] sm:$0xff]   ;;  %v2288_v50 = vld [vmem:[%s2584_s18 + $0x58] sm:$0xff]  }
  0x25   : > { %2085 = vmatpush3.msra.mxu0 %v536_v4  ;;  %v535_v7 = vadd.f32 %v526_v6, %v525_v5  ;;  %v2286_v48 = vld [vmem:[%s2584_s18 + $0x60] sm:$0xff]   ;;  %v2289_v51 = vld [vmem:[%s2584_s18 + $0x18] sm:$0xff]   ;;  %v2290_v52 = vld [vmem:[%s2584_s18 + $0x50] sm:$0xff]   ;;  %v2654_v4 = vrot.slane %v1953_v63, %v938_v61  ;;  %v2658_v6 = vrot.slane %v1953_v63, %v934_v2 }
  0x26   : > { %s3001_s29 = smov (!%p512_p0, %s1939_s29), 15  ;;  %2025 = vmatprep.subr.bf16.mxu0 %v2280_v40  ;;  %v2287_v49 = vld [vmem:[%s2584_s18 + $0x20] sm:$0xff]   ;;  %v2291_v53 = vld [vmem:[%s2584_s18 + $0x10] sm:$0xff]   ;;  %v2292_v54 = vld [vmem:[%s2584_s18 + $0x48] sm:$0xff]  }
  0x27   : > { %2087 = vmatmul.mubr.msk.f32.vlgmr.msra.gmra.mxu0 %vm547_vm1, %v535_v7  ;;  %s515_s20 = sadd.s32 %s1940_s14, %s3001_s29  ;;  %v2293_v55 = vld [vmem:[%s2584_s18 + $0x8] sm:$0xff]   ;;  %v2294_v56 = vld [vmem:[%s2584_s18 + $0x40] sm:$0xff]  }
  0x28   : > { %s1941_s30 = sshll.u32 %s515_s20, 3  ;;  %2026 = vmatpush3.bf16.msra.mxu0 %v2281_v41  ;;  %v2295_v57 = vld [vmem:[%s2584_s18] sm:$0xff]   ;;  %s2409_s20 = smov 96  }
  0x29   : > { %s2603_s23 = scalar_lea.vmem %s2948_s2, %s1941_s30  ;;  %2027 = vmatprep.subr.bf16.mxu0 %v2282_v43  ;;  %v928_v3 = vld [vmem:[%s2950_s4] ss:$2 sm:$0x3] }
  0x2a   : > { %v527_v28 = vld [vmem:[%s2603_s23] sm:$0xff]  ;;  %v528_v29 = vld [vmem:[%s2603_s23 + $0x8] sm:$0xff]  ;;  %v529_v33 = vld [vmem:[%s2603_s23 + $0x10] sm:$0xff]  ;;  %v2656_v5 = vrot.slane %v928_v3, %v934_v2  ;;  %v2660_v7 = vrot.slane %v928_v3, %v938_v61 }
  0x2b   : > { %v530_v35 = vld [vmem:[%s2603_s23 + $0x18] sm:$0xff]  ;;  %v532_v36 = vld [vmem:[%s2603_s23 + $0x28] sm:$0xff]  ;;  %v531_v39 = vld [vmem:[%s2603_s23 + $0x20] sm:$0xff] }
  0x2c   : > { %v534_v42 = vld [vmem:[%s2603_s23 + $0x38] sm:$0xff]  ;;  %2028 = vmatpush3.bf16.msra.mxu0 %v2283_v44  ;;  %v533_v47 = vld [vmem:[%s2603_s23 + $0x30] sm:$0xff]  ;;  %s2981_s23 = sld [smem:[#allocation14_spill]] }
  0x2d   : > { %2029 = vmatprep.subr.bf16.mxu0 %v2284_v45  ;;  %v821_v61 = vld [vmem:[%s2957_s11 + $0x70] sm:$0xff] }
  0x30   : > { %2030 = vmatpush3.bf16.msra.mxu0 %v2285_v46 }
  0x31   : > { %2031 = vmatprep.subr.bf16.mxu0 %v2286_v48 }
  0x32   : > { %s2982_s17 = smov %s2981_s23 }
  0x34   : > { %2032 = vmatpush3.bf16.msra.mxu0 %v2287_v49 }
  0x35   : > { %2033 = vmatprep.subr.bf16.mxu0 %v2288_v50 }
  0x38   : > { %2034 = vmatpush3.bf16.msra.mxu0 %v2289_v51  ;;  %v654_v51 = vld [vmem:[%s2955_s9 + $0x8] sm:$0xff] }
  0x39   : > { %2035 = vmatprep.subr.bf16.mxu0 %v2290_v52 }
  0x3c   : > { %2036 = vmatpush3.bf16.msra.mxu0 %v2291_v53 }
  0x3d   : > { %2037 = vmatprep.subr.bf16.mxu0 %v2292_v54  ;;  %v822_v54 = vld [vmem:[%s2957_s11 + $0x78] sm:$0xff] }
  0x40   : > { %2038 = vmatpush3.bf16.msra.mxu0 %v2293_v55 }
  0x41   : > { %2039 = vmatprep.subr.bf16.mxu0 %v2294_v56 }
  0x44   : > { %2040 = vmatpush3.bf16.msra.mxu0 %v2295_v57 }
  0xe7   : > { %v617_v9 = vpop.f32.mrf.mxu0 }
  0xe8   : > { %v618_v10 = vadd.f32 %v1943_v8, %v617_v9 }
  0xe9   : > { %v2088_v11 = vpop.f32.mrf.mxu0 }
  0xea   : > { %621 = vrot.lane.b32.xlu0 %v618_v10, %s2401_s21 }
 0x15c   : > { %v622_v12 = vpop.permute.xlu0 %621 }
 0x15d   : > { %v623_v13 = vmax.f32 %v618_v10, %v622_v12 }
 0x15f   : > { %624 = vrot.lane.b32.xlu0 %v623_v13, %s2402_s12 }
 0x1d1   : > { %v625_v14 = vpop.permute.xlu0 %624 }
 0x1d2   : > { %v626_v15 = vmax.f32 %v623_v13, %v625_v14 }
 0x1d4   : > { %627 = vrot.lane.b32.xlu1 %v626_v15, %s2403_s27 }
 0x246   : > { %v628_v16 = vpop.permute.xlu1 %627 }
 0x247   : > { %v629_v17 = vmax.f32 %v626_v15, %v628_v16 }
 0x249   : > { %630 = vrot.lane.b32.xlu1 %v629_v17, %s2404_s28 }
 0x2bb   : > { %v631_v18 = vpop.permute.xlu1 %630 }
 0x2bc   : > { %v632_v19 = vmax.f32 %v629_v17, %v631_v18 }
 0x2be   : > { %v633_v20 = vsub.f32 %v618_v10, %v632_v19 }
 0x2c0   : > { %v634_v21 = vmul.f32 1.442695, %v633_v20 }
 0x2c2   : > { %2300 = vpow2.f32 %v634_v21 }
 0x2cf   : > { %v2592_v22 = vpop.eup %2300 }
 0x2d0   : > { %636 = vrot.lane.b32.xlu0 %v2592_v22, %s2401_s21  ;;  %s490_s21 = sand.u32 1, %s2373_s22  }
 0x342   : > { %v637_v23 = vpop.permute.xlu0 %636 }
 0x343   : > { %v638_v24 = vadd.f32 %v2592_v22, %v637_v23 }
 0x345   : > { %639 = vrot.lane.b32.xlu1 %v638_v24, %s2402_s12  ;;  %s1934_s12 = sshll.u32 %s490_s21, 3 }
 0x3b7   : > { %v640_v26 = vpop.permute.xlu1 %639 }
 0x3b8   : > { %v641_v27 = vadd.f32 %v640_v26, %v638_v24 }
 0x3ba   : > { %642 = vrot.lane.b32.xlu0 %v641_v27, %s2403_s27  ;;  %s1983_s27 = sshll.u32 %s2385_s25, 1 }
 0x3be   : > { %944 = vperm.xlu0 %2257, %v527_v28  }
 0x3c2   : > { %2260 = vset.pattern.permute.xlu0 %v2406_v30 }
 0x3c3   : > { %1062 = vperm.xlu0 %2260, %v528_v29  }
 0x3c7   : > { %1066 = vperm.xlu0 %2260, %v529_v33  }
 0x3cb   : > { %1078 = vperm.xlu0 %2260, %v532_v36  }
 0x3cf   : > { %2269 = vset.pattern.permute.xlu0 %v2408_v38 }
 0x3d0   : > { %1465 = vperm.xlu0 %2269, %v528_v29  }
 0x3d4   : > { %1469 = vperm.xlu0 %2269, %v529_v33  }
 0x3d8   : > { %1477 = vperm.xlu0 %2269, %v531_v39  }
 0x3dc   : > { %2271 = vset.pattern.permute.xlu0 %v2407_v37 }
 0x3dd   : > { %1393 = vperm.xlu0 %2271, %v527_v28  }
 0x3e1   : > { %1421 = vperm.xlu0 %2271, %v534_v42  }
 0x3e5   : > { %2274 = vset.pattern.permute.xlu0 %v2405_v25 }
 0x3e6   : > { %964 = vperm.xlu0 %2274, %v531_v39  }
 0x3ea   : > { %974 = vperm.xlu0 %2274, %v533_v47  }
 0x3ee   : > { %2278 = vset.pattern.permute.xlu0 %v2406_v30 }
 0x3ef   : > { %1086 = vperm.xlu0 %2278, %v534_v42  }
 0x3f3   : > { %2279 = vset.pattern.permute.xlu0 %v2408_v38 }
 0x42c   : > { %v643_v31 = vpop.permute.xlu0 %642 }
 0x42d   : > { %v2608_v32 = vadd.f32 %v643_v31, %v641_v27 }
 0x42f   : > { %645 = vrot.lane.b32.xlu1 %v2608_v32, %s2404_s28  ;;  %s1799_s28 = sadd.s32 %s2381_s24, %s1983_s27  ;;  %s1788_s24 = scalar_lea.sflag [#allocation3], %s490_s21 }
 0x430   : > { %s1984_s14 = sshll.u32 %s1799_s28, 7  ;;  %s2410_s27 = smov [#allocation2]  }
 0x431   : > { %s1801_s26 = scalar_lea.hbm %s2981_s23, %s1984_s14 }
 0x433   : > { %949 = vperm.xlu1 %2258, %v528_v29  }
 0x437   : > { %2259 = vset.pattern.permute.xlu1 %v2406_v30 }
 0x438   : > { %1058 = vperm.xlu1 %2259, %v527_v28  }
 0x439   : > { %v945_v0 = vpop.permute.xlu0 %944 }
 0x43a   : > { %v982_v10 = vsub.f32 %v2656_v5, %v945_v0  ;;  %v983_v12 = vsub.f32 %v2660_v7, %v945_v0 }
 0x43c   : > { %2261 = vset.pattern.permute.xlu1 %v2405_v25  ;;  %v998_v17 = vand.u32 2147483647, %v982_v10  ;;  %v999_v19 = vand.u32 2147483647, %v983_v12  ;;  %v657_v12 = vld [vmem:[%s2955_s9 + $0x20] sm:$0xff] }
 0x43d   : > { %954 = vperm.xlu1 %2261, %v529_v33  }
 0x43e   : > { %v1063_v8 = vpop.permute.xlu0 %1062  ;;  %v1015_v34 = vsub.f32 1.0, %v999_v19  ;;  %v819_v19 = vld [vmem:[%s2957_s11 + $0x60] sm:$0xff] }
 0x43f   : > { %v1092_v9 = vsub.f32 %v2654_v4, %v1063_v8  ;;  %v1091_v11 = vsub.f32 %v2658_v6, %v1063_v8  ;;  %v656_v8 = vld [vmem:[%s2955_s9 + $0x18] sm:$0xff] }
 0x440   : > { %v1031_v50 = vmax.f32 %v1015_v34, 0.0  ;;  %v817_v34 = vld [vmem:[%s2957_s11 + $0x50] sm:$0xff] }
 0x441   : > { %959 = vperm.xlu1 %2261, %v530_v35   ;;  %v1108_v13 = vand.u32 2147483647, %v1092_v9  ;;  %v1107_v18 = vand.u32 2147483647, %v1091_v11  ;;  %v820_v11 = vld [vmem:[%s2957_s11 + $0x68] sm:$0xff] }
 0x443   : > { %v1124_v24 = vsub.f32 1.0, %v1108_v13 }
 0x445   : > { %2262 = vset.pattern.permute.xlu1 %v2406_v30 }
 0x446   : > { %1070 = vperm.xlu1 %2262, %v530_v35  }
 0x44a   : > { %2263 = vset.pattern.permute.xlu1 %v2407_v37 }
 0x44b   : > { %1397 = vperm.xlu1 %2263, %v528_v29   ;;  %v1014_v29 = vsub.f32 1.0, %v998_v17 }
 0x44d   : > { %v1030_v43 = vmax.f32 %v1014_v29, 0.0 }
 0x44f   : > { %2264 = vset.pattern.permute.xlu1 %v2408_v38 }
 0x450   : > { %1461 = vperm.xlu1 %2264, %v527_v28  }
 0x454   : > { %2265 = vset.pattern.permute.xlu1 %v2407_v37 }
 0x455   : > { %1401 = vperm.xlu1 %2265, %v529_v33  }
 0x459   : > { %1405 = vperm.xlu1 %2265, %v530_v35  }
 0x45d   : > { %2266 = vset.pattern.permute.xlu1 %v2408_v38 }
 0x45e   : > { %1473 = vperm.xlu1 %2266, %v530_v35   ;;  %v1067_v35 = vpop.permute.xlu0 %1066 }
 0x45f   : > { %v1094_v45 = vsub.f32 %v2654_v4, %v1067_v35 }
 0x462   : > { %2267 = vset.pattern.permute.xlu1 %v2405_v25 }
 0x463   : > { %969 = vperm.xlu1 %2267, %v532_v36  }
 0x467   : > { %2268 = vset.pattern.permute.xlu1 %v2406_v30 }
 0x468   : > { %1074 = vperm.xlu1 %2268, %v531_v39  }
 0x46c   : > { %2270 = vset.pattern.permute.xlu1 %v2407_v37 }
 0x46d   : > { %1409 = vperm.xlu1 %2270, %v531_v39  }
 0x471   : > { %1413 = vperm.xlu1 %2270, %v532_v36  }
 0x475   : > { %2272 = vset.pattern.permute.xlu1 %v2408_v38 }
 0x476   : > { %1481 = vperm.xlu1 %2272, %v532_v36   ;;  %v1140_v36 = vmax.f32 %v1124_v24, 0.0 }
 0x47a   : > { %2273 = vset.pattern.permute.xlu1 %v2407_v37  ;;  %v1093_v37 = vsub.f32 %v2658_v6, %v1067_v35 }
 0x47b   : > { %1417 = vperm.xlu1 %2273, %v533_v47  }
 0x47c   : > { %v1109_v58 = vand.u32 2147483647, %v1093_v37 }
 0x47e   : > { %v1125_v13 = vsub.f32 1.0, %v1109_v58 }
 0x47f   : > { %2275 = vset.pattern.permute.xlu1 %v2408_v38 }
 0x480   : > { %1485 = vperm.xlu1 %2275, %v533_v47  }
 0x484   : > { %1489 = vperm.xlu1 %2275, %v534_v42  }
 0x488   : > { %2276 = vset.pattern.permute.xlu1 %v2405_v25 }
 0x489   : > { %979 = vperm.xlu1 %2276, %v534_v42  }
 0x48d   : > { %2277 = vset.pattern.permute.xlu1 %v2406_v30  ;;  %v1123_v30 = vsub.f32 1.0, %v1107_v18 }
 0x48e   : > { %1082 = vperm.xlu1 %2277, %v533_v47  }
 0x48f   : > { %v1139_v44 = vmax.f32 %v1123_v30, 0.0 }
 0x4a1   : > { %v646_v60 = vpop.permute.xlu1 %645 }
 0x4a2   : > { %v647_v62 = vadd.f32 %v646_v60, %v2608_v32  ;;  %v1110_v60 = vand.u32 2147483647, %v1094_v45 }
 0x4a4   : > { %2302 = vrcp.f32 %v647_v62  ;;  %v1126_v18 = vsub.f32 1.0, %v1110_v60 }
 0x4ae   : > { %v950_v14 = vpop.permute.xlu1 %949 }
 0x4af   : > { %v984_v15 = vsub.f32 %v2656_v5, %v950_v14  ;;  %v985_v16 = vsub.f32 %v2660_v7, %v950_v14 }
 0x4b1   : > { %v2303_v20 = vpop.eup %2302  ;;  %v1000_v21 = vand.u32 2147483647, %v984_v15  ;;  %v1001_v23 = vand.u32 2147483647, %v985_v16 }
 0x4b2   : > { %v649_v25 = vmul.f32 %v2303_v20, %v647_v62 }
 0x4b3   : > { %v1016_v26 = vsub.f32 1.0, %v1000_v21  ;;  %v1017_v27 = vsub.f32 1.0, %v1001_v23  ;;  %v1059_v28 = vpop.permute.xlu1 %1058  ;;  %v658_v23 = vld [vmem:[%s2955_s9 + $0x28] sm:$0xff] }
 0x4b4   : > { %v650_v31 = vsub.f32 2.0, %v649_v25  ;;  %v1089_v32 = vsub.f32 %v2658_v6, %v1059_v28  ;;  %v1090_v33 = vsub.f32 %v2654_v4, %v1059_v28  ;;  %v818_v25 = vld [vmem:[%s2957_s11 + $0x58] sm:$0xff] }
 0x4b5   : > { %v1033_v39 = vmax.f32 %v1017_v27, 0.0  ;;  %v1032_v42 = vmax.f32 %v1016_v26, 0.0  ;;  %v659_v26 = vld [vmem:[%s2955_s9 + $0x30] sm:$0xff] }
 0x4b6   : > { %v651_v38 = vmul.f32 %v2303_v20, %v650_v31  ;;  %v1105_v40 = vand.u32 2147483647, %v1089_v32  ;;  %v1106_v41 = vand.u32 2147483647, %v1090_v33  ;;  %v2719_v31 = vld [vmem:[%s2950_s4 + $0x4] ss:$0 sm:$0xff] }
 0x4b7   : > { %v1156_v57 = vmul.f32 %v1140_v36, %v1033_v39  ;;  %v1155_v59 = vmul.f32 %v1139_v44, %v1032_v42  ;;  %v1141_v32 = vmax.f32 %v1125_v13, 0.0  ;;  %v1142_v33 = vmax.f32 %v1126_v18, 0.0  ;;  %v2725_v39 = vpop.permute.xlu0 %1078  ;;  %v810_v18 = vld [vmem:[%s2957_s11 + $0x18] sm:$0xff] }
 0x4b8   : > { %v652_v46 = vmul.f32 %v2592_v22, %v651_v38  ;;  %v1121_v47 = vsub.f32 1.0, %v1105_v40  ;;  %v1122_v48 = vsub.f32 1.0, %v1106_v41  ;;  %v955_v49 = vpop.permute.xlu1 %954  ;;  %v655_v22 = vld [vmem:[%s2955_s9 + $0x10] sm:$0xff]  ;;  %v660_v40 = vld [vmem:[%s2955_s9 + $0x38] sm:$0xff]  ;;  %v816_v41 = vld [vmem:[%s2957_s11 + $0x48] sm:$0xff] }
 0x4b9   : > { %v986_v52 = vsub.f32 %v2656_v5, %v955_v49  ;;  %v987_v53 = vsub.f32 %v2660_v7, %v955_v49  ;;  %v815_v49 = vld [vmem:[%s2957_s11 + $0x40] sm:$0xff] }
 0x4ba   : > { %2089 = vmatprep.subr.mxu1 %v652_v46  ;;  %v1137_v55 = vmax.f32 %v1121_v47, 0.0  ;;  %v1138_v56 = vmax.f32 %v1122_v48, 0.0  ;;  %v2738_v48 = vld [vmem:[%s2950_s4 + $0x5] ss:$0 sm:$0xff] }
 0x4bb   : > { %2090 = vmatpush3.msra.mxu1 %v652_v46  ;;  %v1002_v62 = vand.u32 2147483647, %v986_v52  ;;  %v1003_v63 = vand.u32 2147483647, %v987_v53 }
 0x4bc   : > { %2092 = vmatmul.mubr.msk.f32.vlgmr.msra.gmra.mxu1 %vm661_vm2, %v654_v51  ;;  %v960_v0 = vpop.permute.xlu1 %959  ;;  %v1153_v2 = vmul.f32 %v1137_v55, %v1030_v43  ;;  %v1154_v3 = vmul.f32 %v1138_v56, %v1031_v50  ;;  %2103 = vmatprep.subr.mxu1 %v822_v54  ;;  %v814_v55 = vld [vmem:[%s2957_s11 + $0x38] sm:$0xff] }
 0x4bd   : > { %2094 = vmatprep.mubr.msk.f32.mxu1 %vm661_vm2, %v655_v22  ;;  %v988_v9 = vsub.f32 %v2656_v5, %v960_v0  ;;  %v989_v10 = vsub.f32 %v2660_v7, %v960_v0  ;;  %2104 = vmatpush3.msra.mxu1 %v822_v54  ;;  %v1018_v20 = vsub.f32 1.0, %v1002_v62  ;;  %v1019_v21 = vsub.f32 1.0, %v1003_v63  ;;  %v1466_v22 = vpop.permute.xlu0 %1465 }
 0x4be   : > { %2105 = vmatprep.subr.mxu1 %v821_v61  ;;  %v1170_v14 = vpack.c.bf16 %v1156_v57, %v1154_v3  ;;  %v1169_v17 = vpack.c.bf16 %v1155_v59, %v1153_v2  ;;  %v1493_v58 = vsub.f32 %v2738_v48, %v1466_v22  ;;  %v812_v3 = vld [vmem:[%s2957_s11 + $0x28] sm:$0xff] }
 0x4bf   : > { %v1004_v15 = vand.u32 2147483647, %v988_v9  ;;  %v1005_v16 = vand.u32 2147483647, %v989_v10  ;;  %2106 = vmatpush3.msra.mxu1 %v821_v61  ;;  %v1034_v35 = vmax.f32 %v1018_v20, 0.0  ;;  %v1035_v36 = vmax.f32 %v1019_v21, 0.0 }
 0x4c0   : > { %2095 = vmatmul.mubr.msk.f32.gmra.mxu1 %vm661_vm2, %v656_v8  ;;  %2107 = vmatprep.subr.mxu1 %v820_v11  ;;  %v813_v61 = vld [vmem:[%s2957_s11 + $0x30] sm:$0xff]  ;;  %v1501_v62 = vand.u32 2147483647, %v1493_v58  ;;  %v1099_v58 = vsub.f32 %v2658_v6, %v2725_v39 }
 0x4c1   : > { %2097 = vmatprep.mubr.msk.f32.mxu1 %vm661_vm2, %v657_v12  ;;  %v1071_v24 = vpop.permute.xlu1 %1070  ;;  %2108 = vmatpush3.msra.mxu1 %v820_v11  ;;  %v1020_v27 = vsub.f32 1.0, %v1004_v15  ;;  %v1021_v28 = vsub.f32 1.0, %v1005_v16  ;;  %v1157_v52 = vmul.f32 %v1141_v32, %v1034_v35  ;;  %v1158_v53 = vmul.f32 %v1142_v33, %v1035_v36  ;;  %v1470_v2 = vpop.permute.xlu0 %1469  ;;  %v811_v12 = vld [vmem:[%s2957_s11 + $0x20] sm:$0xff] }
 0x4c2   : > { %v1095_v29 = vsub.f32 %v2658_v6, %v1071_v24  ;;  %v1096_v30 = vsub.f32 %v2654_v4, %v1071_v24  ;;  %2109 = vmatprep.subr.mxu1 %v819_v19  ;;  %1337 = vmatprep.mubr.bf16.mxu0 %v1170_v14  ;;  %v1509_v9 = vsub.f32 1.0, %v1501_v62  ;;  %v1494_v10 = vsub.f32 %v2738_v48, %v1470_v2 }
 0x4c3   : > { %2110 = vmatpush3.msra.mxu1 %v819_v19  ;;  %1338 = vmatmul.mubr.bf16.vlgmr.msra.gmra.mxu0 %v1169_v17  ;;  %v1036_v42 = vmax.f32 %v1020_v27, 0.0  ;;  %v1037_v43 = vmax.f32 %v1021_v28, 0.0 }
 0x4c4   : > { %2098 = vmatmul.mubr.msk.f32.gmra.mxu1 %vm661_vm2, %v658_v23  ;;  %v1111_v37 = vand.u32 2147483647, %v1095_v29  ;;  %v1112_v38 = vand.u32 2147483647, %v1096_v30  ;;  %2111 = vmatprep.subr.mxu1 %v818_v25  ;;  %v1517_v14 = vmax.f32 %v1509_v9, 0.0 }
 0x4c5   : > { %2100 = vmatprep.mubr.msk.f32.mxu1 %vm661_vm2, %v659_v26  ;;  %2112 = vmatpush3.msra.mxu1 %v818_v25  ;;  %v1502_v15 = vand.u32 2147483647, %v1494_v10  ;;  %v1478_v17 = vpop.permute.xlu0 %1477  ;;  %v1115_v10 = vand.u32 2147483647, %v1099_v58 }
 0x4c6   : > { %v1127_v44 = vsub.f32 1.0, %v1111_v37  ;;  %v1128_v45 = vsub.f32 1.0, %v1112_v38  ;;  %v1398_v46 = vpop.permute.xlu1 %1397  ;;  %2113 = vmatprep.subr.mxu1 %v817_v34 }
 0x4c7   : > { %v1425_v47 = vsub.f32 %v2719_v31, %v1398_v46  ;;  %2114 = vmatpush3.msra.mxu1 %v817_v34  ;;  %v1510_v20 = vsub.f32 1.0, %v1502_v15 }
 0x4c8   : > { %2101 = vmatmul.mubr.msk.f32.gmra.mxu1 %vm661_vm2, %v660_v40  ;;  %v1143_v50 = vmax.f32 %v1127_v44, 0.0  ;;  %v1144_v51 = vmax.f32 %v1128_v45, 0.0  ;;  %2115 = vmatprep.subr.mxu1 %v816_v41 }
 0x4c9   : > { %v1433_v54 = vand.u32 2147483647, %v1425_v47  ;;  %2116 = vmatpush3.msra.mxu1 %v816_v41  ;;  %v1518_v27 = vmax.f32 %v1510_v20, 0.0  ;;  %v1394_v28 = vpop.permute.xlu0 %1393 }
 0x4ca   : > { %v1159_v56 = vmul.f32 %v1143_v50, %v1036_v42  ;;  %v1160_v57 = vmul.f32 %v1144_v51, %v1037_v43  ;;  %2117 = vmatprep.subr.mxu1 %v815_v49  ;;  %v1424_v33 = vsub.f32 %v2719_v31, %v1394_v28  ;;  %v1496_v51 = vsub.f32 %v2738_v48, %v1478_v17 }
 0x4cb   : > { %v1441_v59 = vsub.f32 1.0, %v1433_v54  ;;  %v1462_v60 = vpop.permute.xlu1 %1461  ;;  %2118 = vmatpush3.msra.mxu1 %v815_v49 }
 0x4cc   : > { %2119 = vmatprep.subr.mxu1 %v814_v55  ;;  %v1172_v63 = vpack.c.bf16 %v1160_v57, %v1158_v53  ;;  %v1171_v0 = vpack.c.bf16 %v1159_v56, %v1157_v52  ;;  %v1492_v11 = vsub.f32 %v2738_v48, %v1462_v60  ;;  %v1432_v36 = vand.u32 2147483647, %v1424_v33 }
 0x4cd   : > { %2120 = vmatpush3.msra.mxu1 %v814_v55  ;;  %v1449_v8 = vmax.f32 %v1441_v59, 0.0  ;;  %v2770_v47 = vpop.permute.xlu0 %1421  ;;  %v1504_v56 = vand.u32 2147483647, %v1496_v51  ;;  %v1100_v59 = vsub.f32 %v2654_v4, %v2725_v39 }
 0x4ce   : > { %2121 = vmatprep.subr.mxu1 %v813_v61  ;;  %1345 = vmatprep.mubr.bf16.mxu0 %v1172_v63  ;;  %v1500_v21 = vand.u32 2147483647, %v1492_v11  ;;  %v1440_v41 = vsub.f32 1.0, %v1432_v36 }
 0x4cf   : > { %2122 = vmatpush3.msra.mxu1 %v813_v61  ;;  %1346 = vmatmul.mubr.bf16.gmra.mxu0 %v1171_v0  ;;  %v2763_v19 = vmul.f32 %v1517_v14, %v1449_v8  ;;  %v1512_v8 = vsub.f32 1.0, %v1504_v56  ;;  %v1116_v11 = vand.u32 2147483647, %v1100_v59 }
 0x4d0   : > { %v1402_v13 = vpop.permute.xlu1 %1401  ;;  %2123 = vmatprep.subr.mxu1 %v812_v3  ;;  %v1508_v29 = vsub.f32 1.0, %v1500_v21  ;;  %v1448_v43 = vmax.f32 %v1440_v41, 0.0 }
 0x4d1   : > { %v1426_v16 = vsub.f32 %v2719_v31, %v1402_v13  ;;  %2124 = vmatpush3.msra.mxu1 %v812_v3  ;;  %v965_v55 = vpop.permute.xlu0 %964  ;;  %v1520_v21 = vmax.f32 %v1512_v8, 0.0 }
 0x4d2   : > { %2125 = vmatprep.subr.mxu1 %v811_v12  ;;  %v1516_v40 = vmax.f32 %v1508_v29, 0.0  ;;  %v991_v61 = vsub.f32 %v2660_v7, %v965_v55  ;;  %v990_v2 = vsub.f32 %v2656_v5, %v965_v55 }
 0x4d3   : > { %v1434_v23 = vand.u32 2147483647, %v1426_v16  ;;  %2126 = vmatpush3.msra.mxu1 %v811_v12 }
 0x4d4   : > { %v1406_v24 = vpop.permute.xlu1 %1405  ;;  %2127 = vmatprep.subr.mxu1 %v810_v18  ;;  %v2772_v49 = vmul.f32 %v1516_v40, %v1448_v43  ;;  %v1007_v39 = vand.u32 2147483647, %v991_v61  ;;  %v1006_v17 = vand.u32 2147483647, %v990_v2 }
 0x4d5   : > { %v1442_v25 = vsub.f32 1.0, %v1434_v23  ;;  %v1427_v26 = vsub.f32 %v2719_v31, %v1406_v24  ;;  %2128 = vmatpush3.msra.mxu1 %v810_v18  ;;  %v1131_v24 = vsub.f32 1.0, %v1115_v10  ;;  %v809_v10 = vld [vmem:[%s2957_s11 + $0x10] sm:$0xff] }
 0x4d6   : > { %v1532_v52 = vpack.c.bf16 %v2763_v19, %v2772_v49  ;;  %v1023_v29 = vsub.f32 1.0, %v1007_v39  ;;  %v1022_v33 = vsub.f32 1.0, %v1006_v17  ;;  %2129 = vmatprep.subr.mxu1 %v809_v10  ;;  %v1704_v19 = vld [vmem:[%s2953_s7 + $0x18] sm:$0xff] }
 0x4d7   : > { %v1450_v30 = vmax.f32 %v1442_v25, 0.0  ;;  %v1435_v32 = vand.u32 2147483647, %v1427_v26  ;;  %v1132_v25 = vsub.f32 1.0, %v1116_v11  ;;  %2130 = vmatpush3.msra.mxu1 %v809_v10 }
 0x4d8   : > { %v1038_v51 = vmax.f32 %v1022_v33, 0.0 }
 0x4d9   : > { %v1474_v34 = vpop.permute.xlu1 %1473  ;;  %v2767_v35 = vmul.f32 %v1518_v27, %v1450_v30  ;;  %v1443_v37 = vsub.f32 1.0, %v1435_v32  ;;  %v1148_v43 = vmax.f32 %v1132_v25, 0.0 }
 0x4da   : > { %v1495_v38 = vsub.f32 %v2738_v48, %v1474_v34 }
 0x4db   : > { %v1451_v44 = vmax.f32 %v1443_v37, 0.0  ;;  %v1147_v37 = vmax.f32 %v1131_v24, 0.0 }
 0x4dc   : > { %v1503_v42 = vand.u32 2147483647, %v1495_v38 }
 0x4de   : > { %v1511_v45 = vsub.f32 1.0, %v1503_v42  ;;  %v970_v46 = vpop.permute.xlu1 %969 }
 0x4df   : > { %v993_v57 = vsub.f32 %v2660_v7, %v970_v46  ;;  %v992_v62 = vsub.f32 %v2656_v5, %v970_v46 }
 0x4e0   : > { %v1519_v50 = vmax.f32 %v1511_v45, 0.0 }
 0x4e1   : > { %v1009_v9 = vand.u32 2147483647, %v993_v57  ;;  %v1008_v14 = vand.u32 2147483647, %v992_v62  ;;  %v975_v57 = vpop.permute.xlu0 %974 }
 0x4e2   : > { %v2777_v53 = vmul.f32 %v1519_v50, %v1451_v44  ;;  %v1039_v44 = vmax.f32 %v1023_v29, 0.0  ;;  %v995_v29 = vsub.f32 %v2660_v7, %v975_v57 }
 0x4e3   : > { %v1075_v54 = vpop.permute.xlu1 %1074  ;;  %v1025_v23 = vsub.f32 1.0, %v1009_v9  ;;  %v1024_v30 = vsub.f32 1.0, %v1008_v14  ;;  %v808_v14 = vld [vmem:[%s2957_s11 + $0x8] sm:$0xff] }
 0x4e4   : > { %v1533_v22 = vpack.c.bf16 %v2777_v53, %v2767_v35  ;;  %v1098_v60 = vsub.f32 %v2654_v4, %v1075_v54  ;;  %v1097_v63 = vsub.f32 %v2658_v6, %v1075_v54  ;;  %2131 = vmatprep.subr.mxu1 %v808_v14 }
 0x4e5   : > { %v1041_v41 = vmax.f32 %v1025_v23, 0.0  ;;  %v1040_v45 = vmax.f32 %v1024_v30, 0.0  ;;  %2132 = vmatpush3.msra.mxu1 %v808_v14 }
 0x4e6   : > { %v1114_v12 = vand.u32 2147483647, %v1098_v60  ;;  %v1113_v15 = vand.u32 2147483647, %v1097_v63  ;;  %v1431_v60 = vsub.f32 %v2719_v31, %v2770_v47  ;;  %v1087_v47 = vpop.permute.xlu0 %1086 }
 0x4e7   : > { %v1164_v58 = vmul.f32 %v1148_v43, %v1041_v41  ;;  %v1163_v62 = vmul.f32 %v1147_v37, %v1040_v45  ;;  %v1103_v17 = vsub.f32 %v2658_v6, %v1087_v47  ;;  %v1011_v43 = vand.u32 2147483647, %v995_v29 }
 0x4e8   : > { %v1410_v0 = vpop.permute.xlu1 %1409  ;;  %v1130_v26 = vsub.f32 1.0, %v1114_v12  ;;  %v1129_v32 = vsub.f32 1.0, %v1113_v15  ;;  %v1439_v9 = vand.u32 2147483647, %v1431_v60 }
 0x4e9   : > { %v1428_v3 = vsub.f32 %v2719_v31, %v1410_v0  ;;  %v1119_v30 = vand.u32 2147483647, %v1103_v17 }
 0x4ea   : > { %v1146_v42 = vmax.f32 %v1130_v26, 0.0  ;;  %v1145_v46 = vmax.f32 %v1129_v32, 0.0  ;;  %v1447_v24 = vsub.f32 1.0, %v1439_v9  ;;  %v994_v26 = vsub.f32 %v2656_v5, %v975_v57 }
 0x4eb   : > { %v1436_v13 = vand.u32 2147483647, %v1428_v3 }
 0x4ec   : > { %v1414_v16 = vpop.permute.xlu1 %1413  ;;  %v1162_v61 = vmul.f32 %v1146_v42, %v1039_v44  ;;  %v1161_v0 = vmul.f32 %v1145_v46, %v1038_v51  ;;  %v1135_v46 = vsub.f32 1.0, %v1119_v30 }
 0x4ed   : > { %v1444_v18 = vsub.f32 1.0, %v1436_v13  ;;  %v1429_v20 = vsub.f32 %v2719_v31, %v1414_v16 }
 0x4ee   : > { %v1174_v11 = vpack.c.bf16 %v1164_v58, %v1162_v61  ;;  %v1173_v39 = vpack.c.bf16 %v1163_v62, %v1161_v0  ;;  %v1151_v60 = vmax.f32 %v1135_v46, 0.0  ;;  %v798_v46 = vld [vmem:[%s2956_s10 + $0x38] sm:$0xff] }
 0x4ef   : > { %v1452_v27 = vmax.f32 %v1444_v18, 0.0  ;;  %v1437_v28 = vand.u32 2147483647, %v1429_v20  ;;  %v1104_v18 = vsub.f32 %v2654_v4, %v1087_v47  ;;  %v807_v20 = vld [vmem:[%s2957_s11] sm:$0xff] }
 0x4f0   : > { %1353 = vmatprep.mubr.bf16.mxu0 %v1174_v11  ;;  %2133 = vmatprep.subr.mxu1 %v807_v20 }
 0x4f1   : > { %v1482_v34 = vpop.permute.xlu1 %1481  ;;  %v2793_v36 = vmul.f32 %v1520_v21, %v1452_v27  ;;  %v1445_v38 = vsub.f32 1.0, %v1437_v28  ;;  %1354 = vmatmul.mubr.bf16.gmra.mxu0 %v1173_v39  ;;  %2134 = vmatpush3.msra.mxu1 %v807_v20  ;;  %v1120_v32 = vand.u32 2147483647, %v1104_v18  ;;  %v791_v18 = vld [vmem:[%s2956_s10] sm:$0xff]  ;;  %v792_v20 = vld [vmem:[%s2956_s10 + $0x8] sm:$0xff] }
 0x4f2   : > { %v1497_v40 = vsub.f32 %v2738_v48, %v1482_v34  ;;  %v1455_v34 = vmax.f32 %v1447_v24, 0.0 }
 0x4f3   : > { %v1453_v54 = vmax.f32 %v1445_v38, 0.0 }
 0x4f4   : > { %v1505_v50 = vand.u32 2147483647, %v1497_v40 }
 0x4f6   : > { %v1513_v55 = vsub.f32 1.0, %v1505_v50  ;;  %v1418_v56 = vpop.permute.xlu1 %1417  ;;  %v1136_v50 = vsub.f32 1.0, %v1120_v32 }
 0x4f7   : > { %v1430_v59 = vsub.f32 %v2719_v31, %v1418_v56 }
 0x4f8   : > { %v1521_v63 = vmax.f32 %v1513_v55, 0.0  ;;  %v1152_v61 = vmax.f32 %v1136_v50, 0.0 }
 0x4f9   : > { %v1438_v2 = vand.u32 2147483647, %v1430_v59 }
 0x4fa   : > { %v2799_v3 = vmul.f32 %v1521_v63, %v1453_v54 }
 0x4fb   : > { %v1486_v8 = vpop.permute.xlu1 %1485  ;;  %v1446_v13 = vsub.f32 1.0, %v1438_v2 }
 0x4fc   : > { %v1534_v12 = vpack.c.bf16 %v2799_v3, %v2793_v36  ;;  %v1498_v31 = vsub.f32 %v2738_v48, %v1486_v8  ;;  %v1702_v36 = vld [vmem:[%s2953_s7 + $0x8] sm:$0xff] }
 0x4fd   : > { %v1454_v21 = vmax.f32 %v1446_v13, 0.0  ;;  %v2296_v13 = vld [vmem:[%s2584_s18 + $0x98] sm:$0xff]  }
 0x4fe   : > { %v1506_v15 = vand.u32 2147483647, %v1498_v31  ;;  %2147 = vmatprep.subr.bf16.mxu1 %v2296_v13 }
 0x4ff   : > { %v1490_v16 = vpop.permute.xlu1 %1489 }
 0x500   : > { %v1514_v23 = vsub.f32 1.0, %v1506_v15  ;;  %v1499_v25 = vsub.f32 %v2738_v48, %v1490_v16  ;;  %v1010_v48 = vand.u32 2147483647, %v994_v26  ;;  %v793_v26 = vld [vmem:[%s2956_s10 + $0x10] sm:$0xff] }
 0x502   : > { %v1522_v27 = vmax.f32 %v1514_v23, 0.0  ;;  %v1507_v28 = vand.u32 2147483647, %v1499_v25  ;;  %v1026_v56 = vsub.f32 1.0, %v1010_v48 }
 0x504   : > { %v2818_v33 = vmul.f32 %v1522_v27, %v1454_v21  ;;  %v1515_v37 = vsub.f32 1.0, %v1507_v28  ;;  %v980_v38 = vpop.permute.xlu1 %979  ;;  %v1042_v8 = vmax.f32 %v1026_v56, 0.0  ;;  %v2297_v27 = vld [vmem:[%s2584_s18 + $0x90] sm:$0xff]   ;;  %v794_v28 = vld [vmem:[%s2956_s10 + $0x18] sm:$0xff] }
 0x505   : > { %v996_v40 = vsub.f32 %v2656_v5, %v980_v38  ;;  %v997_v41 = vsub.f32 %v2660_v7, %v980_v38  ;;  %v1027_v5 = vsub.f32 1.0, %v1011_v43  ;;  %v2298_v38 = vld [vmem:[%s2584_s18 + $0x88] sm:$0xff]  }
 0x506   : > { %v1523_v42 = vmax.f32 %v1515_v37, 0.0  ;;  %v795_v37 = vld [vmem:[%s2956_s10 + $0x20] sm:$0xff] }
 0x507   : > { %v1012_v44 = vand.u32 2147483647, %v996_v40  ;;  %v1013_v45 = vand.u32 2147483647, %v997_v41  ;;  %v1043_v9 = vmax.f32 %v1027_v5, 0.0  ;;  %v796_v40 = vld [vmem:[%s2956_s10 + $0x28] sm:$0xff] }
 0x508   : > { %v2822_v51 = vmul.f32 %v1523_v42, %v1455_v34 }
 0x509   : > { %v1028_v54 = vsub.f32 1.0, %v1012_v44  ;;  %v1029_v55 = vsub.f32 1.0, %v1013_v45  ;;  %v1083_v57 = vpop.permute.xlu1 %1082  ;;  %v797_v44 = vld [vmem:[%s2956_s10 + $0x30] sm:$0xff]  ;;  %v2299_v45 = vld [vmem:[%s2584_s18 + $0x80] sm:$0xff]  }
 0x50a   : > { %v1535_v58 = vpack.c.bf16 %v2822_v51, %v2818_v33  ;;  %v1101_v7 = vsub.f32 %v2658_v6, %v1083_v57  ;;  %v1102_v59 = vsub.f32 %v2654_v4, %v1083_v57 }
 0x50b   : > { %v1044_v62 = vmax.f32 %v1028_v54, 0.0  ;;  %v1045_v63 = vmax.f32 %v1029_v55, 0.0 }
 0x50c   : > { %v1117_v0 = vand.u32 2147483647, %v1101_v7  ;;  %v1118_v2 = vand.u32 2147483647, %v1102_v59 }
 0x50d   : > { %v1167_v39 = vmul.f32 %v1151_v60, %v1044_v62  ;;  %v1168_v14 = vmul.f32 %v1152_v61, %v1045_v63 }
 0x50e   : > { %v1133_v10 = vsub.f32 1.0, %v1117_v0  ;;  %v1134_v11 = vsub.f32 1.0, %v1118_v2 }
 0x510   : > { %v1149_v31 = vmax.f32 %v1133_v10, 0.0  ;;  %v1150_v47 = vmax.f32 %v1134_v11, 0.0 }
 0x512   : > { %v1165_v6 = vmul.f32 %v1149_v31, %v1042_v8  ;;  %v1166_v15 = vmul.f32 %v1150_v47, %v1043_v9 }
 0x514   : > { %v1176_v4 = vpack.c.bf16 %v1168_v14, %v1166_v15  ;;  %v1175_v16 = vpack.c.bf16 %v1167_v39, %v1165_v6 }
 0x516   : > { %1361 = vmatprep.mubr.bf16.mxu0 %v1176_v4 }
 0x517   : > { %1362 = vmatmul.mubr.bf16.gmra.mxu0 %v1175_v16 }
 0x57c   : > { %v2093_v17 = vpop.f32.mrf.mxu1 }
 0x57d   : > { %v800_v24 = vmul.f32 %v2093_v17, %v792_v20 }
 0x57e   : > { %v752_v21 = vpop.f32.mrf.mxu1 }
 0x57f   : > { %v799_v23 = vmul.f32 %v791_v18, %v752_v21 }
 0x580   : > { %v2096_v25 = vpop.f32.mrf.mxu1 }
 0x581   : > { %2135 = vmatprep.mubr.f32.mxu1 %v799_v23  ;;  %v802_v32 = vmul.f32 %v2096_v25, %v794_v28 }
 0x582   : > { %v762_v29 = vpop.f32.mrf.mxu1  ;;  %2136 = vmatmul.mubr.f32.vlgmr.msra.gmra.mxu1 %v800_v24 }
 0x583   : > { %v801_v30 = vmul.f32 %v793_v26, %v762_v29  ;;  %2148 = vmatpush3.bf16.msra.mxu1 %v2296_v13  ;;  %v2041_v57 = vpop.f32.mrf.mxu0 }
 0x584   : > { %v2099_v34 = vpop.f32.mrf.mxu1  ;;  %2149 = vmatprep.subr.bf16.mxu1 %v2297_v27 }
 0x585   : > { %2138 = vmatprep.mubr.f32.mxu1 %v801_v30  ;;  %v804_v42 = vmul.f32 %v2099_v34, %v796_v40 }
 0x586   : > { %v772_v41 = vpop.f32.mrf.mxu1  ;;  %2139 = vmatmul.mubr.f32.gmra.mxu1 %v802_v32 }
 0x587   : > { %v803_v48 = vmul.f32 %v795_v37, %v772_v41  ;;  %2150 = vmatpush3.bf16.msra.mxu1 %v2297_v27 }
 0x588   : > { %v2102_v43 = vpop.f32.mrf.mxu1  ;;  %2151 = vmatprep.subr.bf16.mxu1 %v2298_v38 }
 0x589   : > { %2141 = vmatprep.mubr.f32.mxu1 %v803_v48  ;;  %v806_v55 = vmul.f32 %v2102_v43, %v798_v46 }
 0x58a   : > { %v782_v50 = vpop.f32.mrf.mxu1  ;;  %2142 = vmatmul.mubr.f32.gmra.mxu1 %v804_v42 }
 0x58b   : > { %v805_v54 = vmul.f32 %v797_v44, %v782_v50  ;;  %2152 = vmatpush3.bf16.msra.mxu1 %v2298_v38 }
 0x58c   : > { %2153 = vmatprep.subr.bf16.mxu1 %v2299_v45 }
 0x58d   : > { %2144 = vmatprep.mubr.f32.mxu1 %v805_v54 }
 0x58e   : > { %2145 = vmatmul.mubr.f32.gmra.mxu1 %v806_v55 }
 0x58f   : > { %2155 = vmatprep.mubr.msk.bf16.mxu1 %vm1568_vm3, %v1532_v52  ;;  %2154 = vmatpush3.bf16.msra.mxu1 %v2299_v45  ;;  %v1703_v52 = vld [vmem:[%s2953_s7 + $0x10] sm:$0xff] }
 0x590   : > { %2163 = vmatprep.subr.mxu1 %v2399_v1 }
 0x592   : > { %2156 = vmatmul.mubr.msk.bf16.vlgmr.msra.gmra.mxu1 %vm1568_vm3, %v1533_v22 }
 0x593   : > { %2159 = vmatprep.mubr.msk.bf16.mxu1 %vm1568_vm3, %v1534_v12  ;;  %2164 = vmatpush3.msra.mxu1 %v1704_v19  ;;  %v1701_v12 = vld [vmem:[%s2953_s7] sm:$0xff] }
 0x594   : > { %2165 = vmatprep.subr.mxu1 %v2399_v1 }
 0x595   : > { %2166 = vmatpush3.msra.mxu1 %v1703_v52 }
 0x596   : > { %2167 = vmatprep.subr.mxu1 %v2399_v1 }
 0x597   : > { %2168 = vmatpush3.msra.mxu1 %v1702_v36 }
 0x598   : > { %2169 = vmatprep.subr.mxu1 %v2399_v1 }
 0x599   : > { %2170 = vmatpush3.msra.mxu1 %v1701_v12 }
 0x59a   : > { %2160 = vmatmul.mubr.msk.bf16.gmra.mxu1 %vm1568_vm3, %v1535_v58  ;;  %v2042_v58 = vpop.f32.mrf.mxu0 }
 0x59b   : > { %2171 = vmatprep.mubr.msk.f32.mxu1 %vm2400_vm0, %v2399_v1  ;;  %v2043_v39 = vadd.f32 %v2042_v58, %v2041_v57 }
 0x59c   : > { %v2044_v5 = vpop.f32.mrf.mxu0 }
 0x59e   : > { %v2045_v1 = vpop.f32.mrf.mxu0 }
 0x59f   : > { %v2046_v14 = vadd.f32 %v2045_v1, %v2044_v5 }
 0x5a0   : > { %v2047_v7 = vpop.f32.mrf.mxu0 }
 0x5a2   : > { %v2048_v59 = vpop.f32.mrf.mxu0 }
 0x5a3   : > { %v2049_v15 = vadd.f32 %v2048_v59, %v2047_v7 }
 0x5a4   : > { %v2050_v60 = vpop.f32.mrf.mxu0 }
 0x5a6   : > { %v2051_v61 = vpop.f32.mrf.mxu0 }
 0x5a7   : > { %v2052_v18 = vadd.f32 %v2051_v61, %v2050_v60 }
 0x5b1   : > { %v2053_v62 = vpop.f32.mrf.mxu0 }
 0x5b3   : > { %v2054_v63 = vpop.f32.mrf.mxu0 }
 0x5b4   : > { %v2055_v25 = vadd.f32 %v2054_v63, %v2053_v62 }
 0x5b5   : > { %v2056_v2 = vpop.f32.mrf.mxu0 }
 0x5b7   : > { %v2057_v9 = vpop.f32.mrf.mxu0 }
 0x5b8   : > { %v2058_v32 = vadd.f32 %v2057_v9, %v2056_v2  ;;  %v2304_v2 = vld [vmem:[%s2576_s13] sm:$0xff] }
 0x5d7   : > { %v2059_v11 = vpop.f32.mrf.mxu0 }
 0x5d9   : > { %v2060_v6 = vpop.f32.mrf.mxu0 }
 0x5da   : > { %v2061_v43 = vadd.f32 %v2060_v6, %v2059_v11 }
 0x5db   : > { %v2062_v23 = vpop.f32.mrf.mxu0 }
 0x5dd   : > { %v2063_v40 = vpop.f32.mrf.mxu0 }
 0x5de   : > { %v2064_v55 = vadd.f32 %v2063_v40, %v2062_v23 }
 0x642   : > { %v2137_v49 = vpop.f32.mrf.mxu1 }
 0x643   : > { %1656 = vrot.lane.b32.xlu1 %v2137_v49, %s2409_s20  ;;  %v1371_v20 = vmul.f32 %v2137_v49, %v2046_v14 }
 0x644   : > { %v889_v35 = vpop.f32.mrf.mxu1 }
 0x645   : > { %v1370_v21 = vmul.f32 %v2043_v39, %v889_v35 }
 0x646   : > { %v2140_v53 = vpop.f32.mrf.mxu1 }
 0x647   : > { %1654 = vrot.lane.b32.xlu1 %v889_v35, %s2409_s20  ;;  %v1373_v38 = vmul.f32 %v2140_v53, %v2052_v18 }
 0x648   : > { %v899_v22 = vpop.f32.mrf.mxu1 }
 0x649   : > { %1658 = vrot.lane.b32.xlu0 %v899_v22, %s2409_s20  ;;  %v1372_v27 = vmul.f32 %v2049_v15, %v899_v22 }
 0x64a   : > { %v2882_v3 = vpop.f32.mrf.mxu1 }
 0x64b   : > { %1660 = vrot.lane.b32.xlu1 %v2140_v53, %s2409_s20  ;;  %v1375_v35 = vmul.f32 %v2882_v3, %v2058_v32 }
 0x64c   : > { %v909_v33 = vpop.f32.mrf.mxu1 }
 0x64d   : > { %1662 = vrot.lane.b32.xlu0 %v909_v33, %s2409_s20  ;;  %v1374_v45 = vmul.f32 %v2055_v25, %v909_v33 }
 0x64e   : > { %v2888_v51 = vpop.f32.mrf.mxu1 }
 0x64f   : > { %1664 = vrot.lane.b32.xlu1 %v2882_v3, %s2409_s20  ;;  %v1377_v1 = vmul.f32 %v2888_v51, %v2064_v55 }
 0x650   : > { %v919_v56 = vpop.f32.mrf.mxu1 }
 0x651   : > { %1666 = vrot.lane.b32.xlu0 %v919_v56, %s2409_s20  ;;  %v1376_v12 = vmul.f32 %v2061_v43, %v919_v56  ;;  %v1980_v56 = vld [vmem:[%s2954_s8] ss:$0 sm:$0xff] }
 0x652   : > { %v2157_v0 = vpop.f32.mrf.mxu1 }
 0x653   : > { %1668 = vrot.lane.b32.xlu1 %v2888_v51, %s2409_s20  ;;  %s492_s20 = scalar_lea.vmem [#allocation2], %s1934_s12  ;;  %s2309_s12 = sshll.u32 %s2410_s27, 4  ;;  %s2310_s12 = int_to_ptr.vmem [resolvable:$false] %s2309_s12 }
 0x654   : > { %v1615_v8 = vpop.f32.mrf.mxu1  ;;  %s1803_s30 = sshll.u32 %s492_s20, 4  ;;  %s2311_s28 = scalar_lea.vmem %s2310_s12, 256  ;;  %s1804_s30 = int_to_ptr.vmem [resolvable:$true] %s1803_s30 }
 0x655   : > { %s2305_s25 = scalar_lea.vmem %s1804_s30, 128  ;;  %p2312_p5 = scmp.lt.s32.totalorder %s1804_s30, %s2310_s12 }
 0x656   : > { %v2158_v10 = vpop.f32.mrf.mxu1  ;;  %p2306_p1 = scmp.ne.s32.totalorder %s1804_s30, %s2305_s25  ;;  %p2313_p6 = scmp.lt.s32.totalorder %s2311_s28, %s2305_s25 }
 0x658   : > { %v1618_v13 = vpop.f32.mrf.mxu1  ;;  %p2307_p2 = pnand %p2306_p1, %p2527_p3  ;;  %p2314_p7 = por %p2313_p6, %p2312_p5 }
 0x65a   : > { %v2161_v31 = vpop.f32.mrf.mxu1  ;;  %p2308_p4 = pneg %p2307_p2 }
 0x65c   : > { %v1631_v16 = vpop.f32.mrf.mxu1  ;;  %p2315_p9 = pnand %p2314_p7, %p2308_p4 }
 0x65e   : > { %v2162_v34 = vpop.f32.mrf.mxu1 }
 0x660   : > { %v1634_v19 = vpop.f32.mrf.mxu1 }
 0x6b5   : > { %v1657_v47 = vpop.permute.xlu1 %1656 }
 0x6b6   : > { %v1679_v4 = vmul.f32 %v1657_v47, %v1618_v13 }
 0x6b8   : > { %v1687_v28 = vadd.f32 %v1679_v4, %v1371_v20 }
 0x6b9   : > { %v1655_v17 = vpop.permute.xlu1 %1654 }
 0x6ba   : > { %v1678_v24 = vmul.f32 %v1655_v17, %v1615_v8 }
 0x6bb   : > { %v1659_v26 = vpop.permute.xlu0 %1658 }
 0x6bc   : > { %v1686_v29 = vadd.f32 %v1678_v24, %v1370_v21  ;;  %v1680_v30 = vmul.f32 %v2157_v0, %v1659_v26 }
 0x6bd   : > { %v1661_v37 = vpop.permute.xlu1 %1660 }
 0x6be   : > { %v1694_v41 = vadd.f32 %v1687_v28, %v1686_v29  ;;  %v1688_v48 = vadd.f32 %v1680_v30, %v1372_v27  ;;  %v1681_v42 = vmul.f32 %v2158_v10, %v1661_v37 }
 0x6bf   : > { %v1663_v44 = vpop.permute.xlu0 %1662 }
 0x6c0   : > { %v1695_v46 = vadd.f32 %v1694_v41, %v1688_v48  ;;  %v1689_v50 = vadd.f32 %v1681_v42, %v1373_v38  ;;  %v1682_v54 = vmul.f32 %v1663_v44, %v1631_v16 }
 0x6c1   : > { %v1665_v49 = vpop.permute.xlu1 %1664 }
 0x6c2   : > { %v1696_v52 = vadd.f32 %v1695_v46, %v1689_v50  ;;  %v1690_v22 = vadd.f32 %v1682_v54, %v1374_v45  ;;  %v1683_v36 = vmul.f32 %v1665_v49, %v1634_v19 }
 0x6c3   : > { %v1667_v53 = vpop.permute.xlu0 %1666 }
 0x6c4   : > { %v1697_v57 = vadd.f32 %v1696_v52, %v1690_v22  ;;  %v1691_v58 = vadd.f32 %v1683_v36, %v1375_v35  ;;  %v1684_v5 = vmul.f32 %v2161_v31, %v1667_v53 }
 0x6c5   : > { %v1669_v33 = vpop.permute.xlu1 %1668 }
 0x6c6   : > { %v1698_v7 = vadd.f32 %v1697_v57, %v1691_v58  ;;  %v1692_v59 = vadd.f32 %v1684_v5, %v1376_v12  ;;  %v1685_v60 = vmul.f32 %v2162_v34, %v1669_v33 }
 0x6c8   : > { %v1699_v61 = vadd.f32 %v1698_v7, %v1692_v59  ;;  %v1693_v3 = vadd.f32 %v1685_v60, %v1377_v1 }
 0x6ca   : > { %v1700_v62 = vadd.f32 %v1699_v61, %v1693_v3 }
 0x6cc   : > { %2172 = vmatmul.mubr.msk.f32.vlgmr.msra.gmra.mxu1 %vm547_vm1, %v1700_v62 }
 0x78c   : > { %v1781_v63 = vpop.f32.mrf.mxu1 }
 0x78d   : > { %v1782_v51 = vadd.f32 %v1980_v56, %v1781_v63 }
 0x78e   : > { %v2173_v0 = vpop.f32.mrf.mxu1 }
 0x78f   : > { %v1785_v8 = vadd.f32 %v2304_v2, %v1782_v51 }
 0x791   : > { %1786 = vst.msk [vmem:[%s492_s20] sm:$0xff] %vm547_vm1, %v1785_v8 }
 0x792   : > { %2318 = shalt.err (!%p2315_p9)
}
 0x793   : > { %s2319_s13 = scalar_lea.hbm %s1801_s26, 128  ;;  %s2323_s18 = scalar_lea.hbm %s2982_s17, 512 }
 0x794   : > { %p2320_p10 = scmp.ne.s32.totalorder %s1801_s26, %s2319_s13  ;;  %p2324_p13 = scmp.lt.s32.totalorder %s1801_s26, %s2982_s17 }
 0x795   : > { %p2325_p0 = scmp.lt.s32.totalorder %s2323_s18, %s2319_s13 }
 0x796   : > { %p2321_p11 = pnand %p2320_p10, %p2527_p3 }
 0x797   : > { %p2326_p1 = por %p2325_p0, %p2324_p13 }
 0x798   : > { %p2322_p12 = pneg %p2321_p11 }
 0x79a   : > { %p2327_p2 = pnand %p2326_p1, %p2322_p12 }
 0x79c   : > { %2330 = shalt.err (!%p2327_p2)
}
 0x79d   : > { %2175 = dma.vmem_to_hbm [thread:$0]  (%p2527_p3), %s1804_s30, 128, %s1801_s26, %s1788_s24  }
 0x79e PF: > { %s2983_s15 = sld [smem:[#allocation9_spill]] }
 0x79f   : > { %s2984_s19 = sld [smem:[#allocation5_spill]] }
 0x7a4   : > { %p2181_p4 = scmp.ge.s32.totalorder %s2983_s15, 2 }
 0x7a5   : > { %s1815_s25 = sand.u32 1, %s2984_s19  }
 0x7a6   : > { %p2178_p5 = pnand %p2181_p4, %p2536_p8  ;;  %s1816_s27 = scalar_lea.sflag [#allocation3], %s1815_s25 }
 0x7a8   : > { %p2179_p6 = pneg %p2178_p5 }
 0x7aa   : > { %2364 = dma.done.wait (%p2179_p6), %s1816_s27, 128  }
 0x7ab   : > { %2366 = vsyncadd (%p2179_p6), %s1816_s27, 4294967168  ;;  %s25_s28 = sadd.s32 1, %s2983_s15   ;;  %s2986_s12 = sld [smem:[#allocation6_spill]] }
 0x7ac   : > { %p22_p7 = scmp.ge.s32.totalorder %s25_s28, 6   ;;  %s2987_s23 = sld [smem:[#allocation13_spill]] }
 0x7ad   : > { %s2988_s24 = sld [smem:[#allocation7_spill]]  ;;  %s2992_s21 = smov %s2373_s22 }
 0x7ae   : > { %s2989_s25 = sld [smem:[#allocation8_spill]]  ;;  %24 = sbr.rel (!%p22_p7) target bundleno = 7 (0x7), region = 113 }
 0x7af   : > { %s2990_s26 = sld [smem:[#allocation10_spill]] }
 0x7b0   : > { %s2991_s27 = sld [smem:[#allocation11_spill]] }
 0x7b1   : > { %s2993_s22 = smov %s2986_s12 }
 0x7b3   :  { %1821 = vsyncpa [#allocation3], 1 }
 0x7b4   :  { %1823 = vsyncpa [#allocation3 + $0x1], 1 }

</bundles_post_ra>
